<compile_context>
chip_gen: v7x
topology: tpu7x:2x2x1
jax: 0.10.0
libtpu: 0.0.40
codegen_flags: <defaults>
</compile_context>

<pallas_src>
import jax
import jax.numpy as jnp
from jax.experimental import pallas as pl
from jax.experimental.pallas import tpu as pltpu

_VMEM_LIMIT = 32 * 1024 * 1024  # safe on v5e/v6e (128 MiB phys) and v7x (64 MiB phys)


def _pick_tile(m, tmax):
    """Lane-dense tile size along M: a multiple of 128 (or the full extent),
    capped at tmax for VMEM, and small enough to give >= 2 grid steps when the
    problem allows so v7x's 2 TensorCores both get work."""
    if m <= 256:
        return m
    half = -(-m // 2)                # cdiv(m, 2)
    half = -(-half // 128) * 128     # round up to a multiple of 128
    return min(tmax, half)


# -----------------------------------------------------------------------------
# Kernel 1: conv matmul with fused bias + 2x2 max-pool + ReLU epilogue.
#   patches: (4, K, M')  -- leading axis = pool position p = ph*2+pw,
#                           rows (c,kh,kw), columns (oh2, ow2, n)
#   out    : (OC, M')    -- already pooled + ReLU'd, lane-dense.
# -----------------------------------------------------------------------------
def _conv_pool_relu_kernel(w_ref, p_ref, b_ref, o_ref):
    z = jnp.dot(w_ref[...], p_ref[0], preferred_element_type=jnp.float32)
    for p in range(1, 4):  # one MXU dot per pool position, max in f32
        z = jnp.maximum(
            z, jnp.dot(w_ref[...], p_ref[p], preferred_element_type=jnp.float32))
    z = z + b_ref[...]                       # bias is invariant across the pool window
    o_ref[...] = jnp.maximum(z, 0.0).astype(o_ref.dtype)


def conv_pool_relu(w, patches, b, *, out_dtype=jnp.bfloat16, tmax=2048):
    """w: (OC,K) bf16, patches: (4,K,M) bf16, b: (OC,1) f32 -> (OC, M) pooled output."""
    OC, K = w.shape
    p4, kp, M = patches.shape
    assert p4 == 4 and kp == K
    tm = _pick_tile(M, tmax)
    grid = (pl.cdiv(M, tm),)
    return pl.pallas_call(
        _conv_pool_relu_kernel,
        out_shape=jax.ShapeDtypeStruct((OC, M), out_dtype),
        grid_spec=pltpu.PrefetchScalarGridSpec(
            num_scalar_prefetch=0,
            grid=grid,
            in_specs=[
                pl.BlockSpec((OC, K), lambda i: (0, 0)),        # weights resident
                pl.BlockSpec((4, K, tm), lambda i: (0, 0, i)),  # patch tile, lane-dense
                pl.BlockSpec((OC, 1), lambda i: (0, 0)),        # bias resident
            ],
            out_specs=pl.BlockSpec((OC, tm), lambda i: (0, i)),
        ),
        compiler_params=pltpu.CompilerParams(
            dimension_semantics=("parallel",),
            vmem_limit_bytes=_VMEM_LIMIT),
    )(w, patches, b)


# -----------------------------------------------------------------------------
# Kernel 2: fused tail  fc1 + relu + (dropout=identity) + fc2 + log_softmax.
# Activations are (features, N) so the batch sits on the lane axis.
# -----------------------------------------------------------------------------
def _fc_tail_kernel(x_ref, w1_ref, b1_ref, w2_ref, b2_ref, o_ref):
    h = jnp.dot(w1_ref[...], x_ref[...], preferred_element_type=jnp.float32)   # (50, tn)
    h = jnp.maximum(h + b1_ref[...], 0.0)
    # TODO(synk): train-mode dropout omitted (inference identity).
    z = jnp.dot(w2_ref[...], h.astype(jnp.bfloat16),
                preferred_element_type=jnp.float32) + b2_ref[...]               # (10, tn)
    m = jnp.max(z, axis=0, keepdims=True)
    s = z - m
    lse = jnp.log(jnp.sum(jnp.exp(s), axis=0, keepdims=True))
    o_ref[...] = (s - lse).astype(o_ref.dtype)


def fc_tail(x, w1, b1, w2, b2):
    K1, N = x.shape          # (500, N)
    H = w1.shape[0]          # 50
    C = w2.shape[0]          # 10
    tn = _pick_tile(N, 1024)
    grid = (pl.cdiv(N, tn),)
    return pl.pallas_call(
        _fc_tail_kernel,
        out_shape=jax.ShapeDtypeStruct((C, N), jnp.float32),
        grid_spec=pltpu.PrefetchScalarGridSpec(
            num_scalar_prefetch=0,
            grid=grid,
            in_specs=[
                pl.BlockSpec((K1, tn), lambda i: (0, i)),
                pl.BlockSpec((H, K1), lambda i: (0, 0)),
                pl.BlockSpec((H, 1), lambda i: (0, 0)),
                pl.BlockSpec((C, H), lambda i: (0, 0)),
                pl.BlockSpec((C, 1), lambda i: (0, 0)),
            ],
            out_specs=pl.BlockSpec((C, tn), lambda i: (0, i)),
        ),
        compiler_params=pltpu.CompilerParams(
            dimension_semantics=("parallel",),
            vmem_limit_bytes=_VMEM_LIMIT),
    )(x, w1, b1, w2, b2)


# -----------------------------------------------------------------------------
# Glue: pool-aware im2col (pure XLA strided slices + stack).
# -----------------------------------------------------------------------------
def _im2col_pooled(x, k):
    """x: (C, H, W, N) -> (patches, (OH2, OW2)) with patches of shape
    (4, C*k*k, OH2*OW2*N).  Leading axis is the 2x2 pool position p = ph*2+pw,
    rows are ordered (c, kh, kw) to match PyTorch's weight.reshape(OC, C*k*k),
    columns are ordered (oh2, ow2, n)."""
    C, H, W, N = x.shape
    OH, OW = H - k + 1, W - k + 1
    assert OH % 2 == 0 and OW % 2 == 0
    OH2, OW2 = OH // 2, OW // 2
    pieces = []
    for ph in range(2):
        for pw in range(2):
            taps = []
            for kh in range(k):
                for kw in range(k):
                    hs, ws = ph + kh, pw + kw
                    s = x[:, hs:hs + 2 * OH2:2, ws:ws + 2 * OW2:2, :]  # (C,OH2,OW2,N)
                    taps.append(s.reshape(C, OH2 * OW2 * N))
            pieces.append(jnp.stack(taps, axis=1).reshape(C * k * k, OH2 * OW2 * N))
    return jnp.stack(pieces, axis=0), (OH2, OW2)


# -----------------------------------------------------------------------------
# Parameters
# -----------------------------------------------------------------------------
def init_params(key):
    """PyTorch-default-style uniform(-1/sqrt(fan_in)) params, PyTorch shapes, f32."""
    ks = jax.random.split(key, 8)

    def u(k, shape, fan_in):
        bound = 1.0 / jnp.sqrt(fan_in)
        return jax.random.uniform(k, shape, jnp.float32, -bound, bound)

    return {
        "conv1_w": u(ks[0], (10, 1, 5, 5), 1 * 5 * 5),
        "conv1_b": u(ks[1], (10,), 1 * 5 * 5),
        "conv2_w": u(ks[2], (20, 10, 5, 5), 10 * 5 * 5),
        "conv2_b": u(ks[3], (20,), 10 * 5 * 5),
        "fc1_w":   u(ks[4], (50, 500), 500),
        "fc1_b":   u(ks[5], (50,), 500),
        "fc2_w":   u(ks[6], (10, 50), 50),
        "fc2_b":   u(ks[7], (10,), 50),
    }


def prepare_params(p):
    """One-time reshape/cast so no per-forward-step casts or bias reshapes are needed."""
    return {
        "w1": p["conv1_w"].reshape(10, 25).astype(jnp.bfloat16),
        "b1": p["conv1_b"].reshape(10, 1).astype(jnp.float32),
        "w2": p["conv2_w"].reshape(20, 250).astype(jnp.bfloat16),
        "b2": p["conv2_b"].reshape(20, 1).astype(jnp.float32),
        "fw1": p["fc1_w"].astype(jnp.bfloat16),          # (50, 500), cols already (c,h,w)
        "fb1": p["fc1_b"].reshape(50, 1).astype(jnp.float32),
        "fw2": p["fc2_w"].astype(jnp.bfloat16),          # (10, 50)
        "fb2": p["fc2_b"].reshape(10, 1).astype(jnp.float32),
    }


# -----------------------------------------------------------------------------
# Forward pass
# -----------------------------------------------------------------------------
def net_forward(prep, x_nchw):
    N = x_nchw.shape[0]
    # NCHW -> (C, H, W, N): keeps spatial*batch on the lane axis everywhere downstream.
    x = jnp.transpose(x_nchw, (1, 2, 3, 0)).astype(jnp.bfloat16)       # (1, 32, 32, N)

    # conv1 + 2x2 max-pool + relu (pool/relu fused into the conv matmul epilogue)
    p1, (oh1, ow1) = _im2col_pooled(x, 5)                              # (4, 25, 14*14*N)
    a1 = conv_pool_relu(prep["w1"], p1, prep["b1"], tmax=4096)         # (10, 196N) bf16
    a1 = a1.reshape(10, oh1, ow1, N)                                   # (10, 14, 14, N)

    # conv2 (Dropout2d == identity) + 2x2 max-pool + relu
    p2, (oh2, ow2) = _im2col_pooled(a1, 5)                             # (4, 250, 25N)
    a2 = conv_pool_relu(prep["w2"], p2, prep["b2"], tmax=2048)         # (20, 25N) bf16

    # x.view(-1, 500): columns are (oh2, ow2, n) so (20, 25N) -> (500, N) is exactly
    # PyTorch's (c, h, w) flatten order; no activation transpose / weight permutation.
    xt = a2.reshape(20 * oh2 * ow2, N)                                 # (500, N) bf16

    # fused fc1 + relu + dropout(identity) + fc2 + log_softmax
    logp = fc_tail(xt, prep["fw1"], prep["fb1"], prep["fw2"], prep["fb2"])   # (10, N) f32
    return jnp.transpose(logp)                                         # (N, 10)


# -----------------------------------------------------------------------------
# Pure-JAX f32 reference (for correctness checking only)
# -----------------------------------------------------------------------------
def reference_forward(params, x_nchw):
    dn = ("NCHW", "OIHW", "NCHW")
    y = jax.lax.conv_general_dilated(x_nchw.astype(jnp.float32), params["conv1_w"],
                                     (1, 1), "VALID", dimension_numbers=dn)
    y = y + params["conv1_b"][None, :, None, None]
    y = jax.lax.reduce_window(y, -jnp.inf, jax.lax.max, (1, 1, 2, 2), (1, 1, 2, 2), "VALID")
    y = jnp.maximum(y, 0.0)
    y = jax.lax.conv_general_dilated(y, params["conv2_w"], (1, 1), "VALID",
                                     dimension_numbers=dn)
    y = y + params["conv2_b"][None, :, None, None]
    y = jax.lax.reduce_window(y, -jnp.inf, jax.lax.max, (1, 1, 2, 2), (1, 1, 2, 2), "VALID")
    y = jnp.maximum(y, 0.0)
    y = y.reshape(y.shape[0], -1)
    y = jnp.maximum(y @ params["fc1_w"].T + params["fc1_b"], 0.0)
    y = y @ params["fc2_w"].T + params["fc2_b"]
    return jax.nn.log_softmax(y, axis=1)


if __name__ == "__main__":
    key = jax.random.PRNGKey(0)
    pkey, xkey = jax.random.split(key)
    params = init_params(pkey)
    prep = prepare_params(params)
    x = jax.random.normal(xkey, (2, 1, 32, 32), dtype=jnp.float32)

    out = jax.jit(net_forward)(prep, x)
    out = jax.block_until_ready(out)

    assert out.shape == (2, 10)
    assert bool(jnp.all(jnp.isfinite(out)))
    # log_softmax rows must exponentiate-sum to 1.
    assert jnp.allclose(jnp.sum(jnp.exp(out), axis=1), 1.0, atol=1e-4)
    # Compare against the f32 XLA reference.  atol is loose because the kernel path
    # uses bf16 activations/weights (inference tolerance only).
    ref = reference_forward(params, x)
    assert jnp.allclose(out, ref, atol=0.15), float(jnp.max(jnp.abs(out - ref)))
    print("KERNEL_OK")
</pallas_src>

<mosaic_0001>
module attributes {stable_mosaic.version = 11 : i64} {
  func.func @_conv_pool_relu_kernel(%arg0: i32, %arg1: memref<10x25xbf16, #tpu.memory_space<vmem>>, %arg2: memref<4x25x256xbf16, #tpu.memory_space<vmem>>, %arg3: memref<10x1xf32, #tpu.memory_space<vmem>>, %arg4: memref<10x256xbf16, #tpu.memory_space<vmem>>) attributes {dimension_semantics = [#tpu.dimension_semantics<parallel>], iteration_bounds = array<i64: 2>, scalar_prefetch = 0 : i64, scratch_operands = 0 : i64, tpu.core_type = #tpu.core_type<tc>, window_params = [{pipeline_mode = #tpu.pipeline_mode<synchronous>, transform_indices = @transform_0, window_bounds = array<i64: 10, 25>}, {transform_indices = @transform_1, window_bounds = array<i64: 4, 25, 256>}, {pipeline_mode = #tpu.pipeline_mode<synchronous>, transform_indices = @transform_2, window_bounds = array<i64: 10, 1>}, {transform_indices = @transform_3, window_bounds = array<i64: 10, 256>}]} {
    %c0 = arith.constant 0 : index
    %c0_0 = arith.constant 0 : index
    %0 = vector.load %arg1[%c0, %c0_0] : memref<10x25xbf16, #tpu.memory_space<vmem>>, vector<10x25xbf16>
    %c0_1 = arith.constant 0 : index
    %c0_2 = arith.constant 0 : index
    %c0_3 = arith.constant 0 : index
    %1 = vector.load %arg2[%c0_1, %c0_2, %c0_3] : memref<4x25x256xbf16, #tpu.memory_space<vmem>>, vector<1x25x256xbf16>
    %2 = vector.shape_cast %1 : vector<1x25x256xbf16> to vector<25x256xbf16>
    %cst = arith.constant dense<0.000000e+00> : vector<10x256xf32>
    %3 = tpu.matmul %0, %2, %cst {dimension_numbers = #tpu.dot_dimension_numbers<[1], [0], [0], [1], [0, 0, 1, 1], [], []>} : vector<10x25xbf16>, vector<25x256xbf16>, vector<10x256xf32> -> vector<10x256xf32>
    %c0_4 = arith.constant 0 : index
    %c0_5 = arith.constant 0 : index
    %4 = vector.load %arg1[%c0_4, %c0_5] : memref<10x25xbf16, #tpu.memory_space<vmem>>, vector<10x25xbf16>
    %c1 = arith.constant 1 : index
    %c0_6 = arith.constant 0 : index
    %c0_7 = arith.constant 0 : index
    %5 = vector.load %arg2[%c1, %c0_6, %c0_7] : memref<4x25x256xbf16, #tpu.memory_space<vmem>>, vector<1x25x256xbf16>
    %6 = vector.shape_cast %5 : vector<1x25x256xbf16> to vector<25x256xbf16>
    %cst_8 = arith.constant dense<0.000000e+00> : vector<10x256xf32>
    %7 = tpu.matmul %4, %6, %cst_8 {dimension_numbers = #tpu.dot_dimension_numbers<[1], [0], [0], [1], [0, 0, 1, 1], [], []>} : vector<10x25xbf16>, vector<25x256xbf16>, vector<10x256xf32> -> vector<10x256xf32>
    %8 = arith.maximumf %3, %7 : vector<10x256xf32>
    %c0_9 = arith.constant 0 : index
    %c0_10 = arith.constant 0 : index
    %9 = vector.load %arg1[%c0_9, %c0_10] : memref<10x25xbf16, #tpu.memory_space<vmem>>, vector<10x25xbf16>
    %c2 = arith.constant 2 : index
    %c0_11 = arith.constant 0 : index
    %c0_12 = arith.constant 0 : index
    %10 = vector.load %arg2[%c2, %c0_11, %c0_12] : memref<4x25x256xbf16, #tpu.memory_space<vmem>>, vector<1x25x256xbf16>
    %11 = vector.shape_cast %10 : vector<1x25x256xbf16> to vector<25x256xbf16>
    %cst_13 = arith.constant dense<0.000000e+00> : vector<10x256xf32>
    %12 = tpu.matmul %9, %11, %cst_13 {dimension_numbers = #tpu.dot_dimension_numbers<[1], [0], [0], [1], [0, 0, 1, 1], [], []>} : vector<10x25xbf16>, vector<25x256xbf16>, vector<10x256xf32> -> vector<10x256xf32>
    %13 = arith.maximumf %8, %12 : vector<10x256xf32>
    %c0_14 = arith.constant 0 : index
    %c0_15 = arith.constant 0 : index
    %14 = vector.load %arg1[%c0_14, %c0_15] : memref<10x25xbf16, #tpu.memory_space<vmem>>, vector<10x25xbf16>
    %c3 = arith.constant 3 : index
    %c0_16 = arith.constant 0 : index
    %c0_17 = arith.constant 0 : index
    %15 = vector.load %arg2[%c3, %c0_16, %c0_17] : memref<4x25x256xbf16, #tpu.memory_space<vmem>>, vector<1x25x256xbf16>
    %16 = vector.shape_cast %15 : vector<1x25x256xbf16> to vector<25x256xbf16>
    %cst_18 = arith.constant dense<0.000000e+00> : vector<10x256xf32>
    %17 = tpu.matmul %14, %16, %cst_18 {dimension_numbers = #tpu.dot_dimension_numbers<[1], [0], [0], [1], [0, 0, 1, 1], [], []>} : vector<10x25xbf16>, vector<25x256xbf16>, vector<10x256xf32> -> vector<10x256xf32>
    %18 = arith.maximumf %13, %17 : vector<10x256xf32>
    %c0_19 = arith.constant 0 : index
    %c0_20 = arith.constant 0 : index
    %19 = vector.load %arg3[%c0_19, %c0_20] : memref<10x1xf32, #tpu.memory_space<vmem>>, vector<10x1xf32>
    %20 = vector.broadcast %19 : vector<10x1xf32> to vector<10x256xf32>
    %21 = arith.addf %18, %20 : vector<10x256xf32>
    %cst_21 = arith.constant 0.000000e+00 : f32
    %22 = vector.broadcast %cst_21 : f32 to vector<10x256xf32>
    %23 = arith.maximumf %21, %22 : vector<10x256xf32>
    %24 = arith.truncf %23 : vector<10x256xf32> to vector<10x256xbf16>
    %c0_22 = arith.constant 0 : index
    %c0_23 = arith.constant 0 : index
    %25 = vector.load %arg4[%c0_22, %c0_23] : memref<10x256xbf16, #tpu.memory_space<vmem>>, vector<10x256xbf16>
    tpu.vector_store %arg4[%c0_22, %c0_23], %24 {strides = array<i32>} : memref<10x256xbf16, #tpu.memory_space<vmem>>, vector<10x256xbf16>,
    return
  }
  func.func @transform_0(%arg0: i32) -> (i32, i32) {
    %c0_i32 = arith.constant 0 : i32
    %c0_i32_0 = arith.constant 0 : i32
    %c0_i32_1 = arith.constant 0 : i32
    return %c0_i32, %c0_i32_0 : i32, i32
  }
  func.func @transform_1(%arg0: i32) -> (i32, i32, i32) {
    %c0_i32 = arith.constant 0 : i32
    %c0_i32_0 = arith.constant 0 : i32
    %c0_i32_1 = arith.constant 0 : i32
    return %c0_i32, %c0_i32_0, %arg0 : i32, i32, i32
  }
  func.func @transform_2(%arg0: i32) -> (i32, i32) {
    %c0_i32 = arith.constant 0 : i32
    %c0_i32_0 = arith.constant 0 : i32
    %c0_i32_1 = arith.constant 0 : i32
    return %c0_i32, %c0_i32_0 : i32, i32
  }
  func.func @transform_3(%arg0: i32) -> (i32, i32) {
    %c0_i32 = arith.constant 0 : i32
    %c0_i32_0 = arith.constant 0 : i32
    return %c0_i32, %arg0 : i32, i32
  }
}

module attributes {stable_mosaic.version = 11 : i64} {
  func.func @_conv_pool_relu_kernel(%arg0: i32, %arg1: memref<20x250xbf16, #tpu.memory_space<vmem>>, %arg2: memref<4x250x50xbf16, #tpu.memory_space<vmem>>, %arg3: memref<20x1xf32, #tpu.memory_space<vmem>>, %arg4: memref<20x50xbf16, #tpu.memory_space<vmem>>) attributes {dimension_semantics = [#tpu.dimension_semantics<parallel>], iteration_bounds = array<i64: 1>, scalar_prefetch = 0 : i64, scratch_operands = 0 : i64, tpu.core_type = #tpu.core_type<tc>, window_params = [{pipeline_mode = #tpu.pipeline_mode<synchronous>, transform_indices = @transform_0, window_bounds = array<i64: 20, 250>}, {transform_indices = @transform_1, window_bounds = array<i64: 4, 250, 50>}, {pipeline_mode = #tpu.pipeline_mode<synchronous>, transform_indices = @transform_2, window_bounds = array<i64: 20, 1>}, {transform_indices = @transform_3, window_bounds = array<i64: 20, 50>}]} {
    %c0 = arith.constant 0 : index
    %c0_0 = arith.constant 0 : index
    %0 = vector.load %arg1[%c0, %c0_0] : memref<20x250xbf16, #tpu.memory_space<vmem>>, vector<20x250xbf16>
    %c0_1 = arith.constant 0 : index
    %c0_2 = arith.constant 0 : index
    %c0_3 = arith.constant 0 : index
    %1 = vector.load %arg2[%c0_1, %c0_2, %c0_3] : memref<4x250x50xbf16, #tpu.memory_space<vmem>>, vector<1x250x50xbf16>
    %2 = vector.shape_cast %1 : vector<1x250x50xbf16> to vector<250x50xbf16>
    %cst = arith.constant dense<0.000000e+00> : vector<20x50xf32>
    %3 = tpu.matmul %0, %2, %cst {dimension_numbers = #tpu.dot_dimension_numbers<[1], [0], [0], [1], [0, 0, 1, 1], [], []>} : vector<20x250xbf16>, vector<250x50xbf16>, vector<20x50xf32> -> vector<20x50xf32>
    %c0_4 = arith.constant 0 : index
    %c0_5 = arith.constant 0 : index
    %4 = vector.load %arg1[%c0_4, %c0_5] : memref<20x250xbf16, #tpu.memory_space<vmem>>, vector<20x250xbf16>
    %c1 = arith.constant 1 : index
    %c0_6 = arith.constant 0 : index
    %c0_7 = arith.constant 0 : index
    %5 = vector.load %arg2[%c1, %c0_6, %c0_7] : memref<4x250x50xbf16, #tpu.memory_space<vmem>>, vector<1x250x50xbf16>
    %6 = vector.shape_cast %5 : vector<1x250x50xbf16> to vector<250x50xbf16>
    %cst_8 = arith.constant dense<0.000000e+00> : vector<20x50xf32>
    %7 = tpu.matmul %4, %6, %cst_8 {dimension_numbers = #tpu.dot_dimension_numbers<[1], [0], [0], [1], [0, 0, 1, 1], [], []>} : vector<20x250xbf16>, vector<250x50xbf16>, vector<20x50xf32> -> vector<20x50xf32>
    %8 = arith.maximumf %3, %7 : vector<20x50xf32>
    %c0_9 = arith.constant 0 : index
    %c0_10 = arith.constant 0 : index
    %9 = vector.load %arg1[%c0_9, %c0_10] : memref<20x250xbf16, #tpu.memory_space<vmem>>, vector<20x250xbf16>
    %c2 = arith.constant 2 : index
    %c0_11 = arith.constant 0 : index
    %c0_12 = arith.constant 0 : index
    %10 = vector.load %arg2[%c2, %c0_11, %c0_12] : memref<4x250x50xbf16, #tpu.memory_space<vmem>>, vector<1x250x50xbf16>
    %11 = vector.shape_cast %10 : vector<1x250x50xbf16> to vector<250x50xbf16>
    %cst_13 = arith.constant dense<0.000000e+00> : vector<20x50xf32>
    %12 = tpu.matmul %9, %11, %cst_13 {dimension_numbers = #tpu.dot_dimension_numbers<[1], [0], [0], [1], [0, 0, 1, 1], [], []>} : vector<20x250xbf16>, vector<250x50xbf16>, vector<20x50xf32> -> vector<20x50xf32>
    %13 = arith.maximumf %8, %12 : vector<20x50xf32>
    %c0_14 = arith.constant 0 : index
    %c0_15 = arith.constant 0 : index
    %14 = vector.load %arg1[%c0_14, %c0_15] : memref<20x250xbf16, #tpu.memory_space<vmem>>, vector<20x250xbf16>
    %c3 = arith.constant 3 : index
    %c0_16 = arith.constant 0 : index
    %c0_17 = arith.constant 0 : index
    %15 = vector.load %arg2[%c3, %c0_16, %c0_17] : memref<4x250x50xbf16, #tpu.memory_space<vmem>>, vector<1x250x50xbf16>
    %16 = vector.shape_cast %15 : vector<1x250x50xbf16> to vector<250x50xbf16>
    %cst_18 = arith.constant dense<0.000000e+00> : vector<20x50xf32>
    %17 = tpu.matmul %14, %16, %cst_18 {dimension_numbers = #tpu.dot_dimension_numbers<[1], [0], [0], [1], [0, 0, 1, 1], [], []>} : vector<20x250xbf16>, vector<250x50xbf16>, vector<20x50xf32> -> vector<20x50xf32>
    %18 = arith.maximumf %13, %17 : vector<20x50xf32>
    %c0_19 = arith.constant 0 : index
    %c0_20 = arith.constant 0 : index
    %19 = vector.load %arg3[%c0_19, %c0_20] : memref<20x1xf32, #tpu.memory_space<vmem>>, vector<20x1xf32>
    %20 = vector.broadcast %19 : vector<20x1xf32> to vector<20x50xf32>
    %21 = arith.addf %18, %20 : vector<20x50xf32>
    %cst_21 = arith.constant 0.000000e+00 : f32
    %22 = vector.broadcast %cst_21 : f32 to vector<20x50xf32>
    %23 = arith.maximumf %21, %22 : vector<20x50xf32>
    %24 = arith.truncf %23 : vector<20x50xf32> to vector<20x50xbf16>
    %c0_22 = arith.constant 0 : index
    %c0_23 = arith.constant 0 : index
    %25 = vector.load %arg4[%c0_22, %c0_23] : memref<20x50xbf16, #tpu.memory_space<vmem>>, vector<20x50xbf16>
    tpu.vector_store %arg4[%c0_22, %c0_23], %24 {strides = array<i32>} : memref<20x50xbf16, #tpu.memory_space<vmem>>, vector<20x50xbf16>,
    return
  }
  func.func @transform_0(%arg0: i32) -> (i32, i32) {
    %c0_i32 = arith.constant 0 : i32
    %c0_i32_0 = arith.constant 0 : i32
    %c0_i32_1 = arith.constant 0 : i32
    return %c0_i32, %c0_i32_0 : i32, i32
  }
  func.func @transform_1(%arg0: i32) -> (i32, i32, i32) {
    %c0_i32 = arith.constant 0 : i32
    %c0_i32_0 = arith.constant 0 : i32
    %c0_i32_1 = arith.constant 0 : i32
    return %c0_i32, %c0_i32_0, %arg0 : i32, i32, i32
  }
  func.func @transform_2(%arg0: i32) -> (i32, i32) {
    %c0_i32 = arith.constant 0 : i32
    %c0_i32_0 = arith.constant 0 : i32
    %c0_i32_1 = arith.constant 0 : i32
    return %c0_i32, %c0_i32_0 : i32, i32
  }
  func.func @transform_3(%arg0: i32) -> (i32, i32) {
    %c0_i32 = arith.constant 0 : i32
    %c0_i32_0 = arith.constant 0 : i32
    return %c0_i32, %arg0 : i32, i32
  }
}

module attributes {stable_mosaic.version = 11 : i64} {
  func.func @_fc_tail_kernel(%arg0: i32, %arg1: memref<500x2xbf16, #tpu.memory_space<vmem>>, %arg2: memref<50x500xbf16, #tpu.memory_space<vmem>>, %arg3: memref<50x1xf32, #tpu.memory_space<vmem>>, %arg4: memref<10x50xbf16, #tpu.memory_space<vmem>>, %arg5: memref<10x1xf32, #tpu.memory_space<vmem>>, %arg6: memref<10x2xf32, #tpu.memory_space<vmem>>) attributes {dimension_semantics = [#tpu.dimension_semantics<parallel>], iteration_bounds = array<i64: 1>, scalar_prefetch = 0 : i64, scratch_operands = 0 : i64, tpu.core_type = #tpu.core_type<tc>, window_params = [{transform_indices = @transform_0, window_bounds = array<i64: 500, 2>}, {pipeline_mode = #tpu.pipeline_mode<synchronous>, transform_indices = @transform_1, window_bounds = array<i64: 50, 500>}, {pipeline_mode = #tpu.pipeline_mode<synchronous>, transform_indices = @transform_2, window_bounds = array<i64: 50, 1>}, {pipeline_mode = #tpu.pipeline_mode<synchronous>, transform_indices = @transform_3, window_bounds = array<i64: 10, 50>}, {pipeline_mode = #tpu.pipeline_mode<synchronous>, transform_indices = @transform_4, window_bounds = array<i64: 10, 1>}, {transform_indices = @transform_5, window_bounds = array<i64: 10, 2>}]} {
    %c0 = arith.constant 0 : index
    %c0_0 = arith.constant 0 : index
    %0 = vector.load %arg2[%c0, %c0_0] : memref<50x500xbf16, #tpu.memory_space<vmem>>, vector<50x500xbf16>
    %c0_1 = arith.constant 0 : index
    %c0_2 = arith.constant 0 : index
    %1 = vector.load %arg1[%c0_1, %c0_2] : memref<500x2xbf16, #tpu.memory_space<vmem>>, vector<500x2xbf16>
    %cst = arith.constant dense<0.000000e+00> : vector<50x2xf32>
    %2 = tpu.matmul %0, %1, %cst {dimension_numbers = #tpu.dot_dimension_numbers<[1], [0], [0], [1], [0, 0, 1, 1], [], []>} : vector<50x500xbf16>, vector<500x2xbf16>, vector<50x2xf32> -> vector<50x2xf32>
    %c0_3 = arith.constant 0 : index
    %c0_4 = arith.constant 0 : index
    %3 = vector.load %arg3[%c0_3, %c0_4] : memref<50x1xf32, #tpu.memory_space<vmem>>, vector<50x1xf32>
    %4 = vector.broadcast %3 : vector<50x1xf32> to vector<50x2xf32>
    %5 = arith.addf %2, %4 : vector<50x2xf32>
    %cst_5 = arith.constant 0.000000e+00 : f32
    %6 = vector.broadcast %cst_5 : f32 to vector<50x2xf32>
    %7 = arith.maximumf %5, %6 : vector<50x2xf32>
    %c0_6 = arith.constant 0 : index
    %c0_7 = arith.constant 0 : index
    %8 = vector.load %arg4[%c0_6, %c0_7] : memref<10x50xbf16, #tpu.memory_space<vmem>>, vector<10x50xbf16>
    %9 = arith.truncf %7 : vector<50x2xf32> to vector<50x2xbf16>
    %cst_8 = arith.constant dense<0.000000e+00> : vector<10x2xf32>
    %10 = tpu.matmul %8, %9, %cst_8 {dimension_numbers = #tpu.dot_dimension_numbers<[1], [0], [0], [1], [0, 0, 1, 1], [], []>} : vector<10x50xbf16>, vector<50x2xbf16>, vector<10x2xf32> -> vector<10x2xf32>
    %c0_9 = arith.constant 0 : index
    %c0_10 = arith.constant 0 : index
    %11 = vector.load %arg5[%c0_9, %c0_10] : memref<10x1xf32, #tpu.memory_space<vmem>>, vector<10x1xf32>
    %12 = vector.broadcast %11 : vector<10x1xf32> to vector<10x2xf32>
    %13 = arith.addf %10, %12 : vector<10x2xf32>
    %cst_11 = arith.constant dense<0xFF800000> : vector<2xf32>
    %14 = vector.multi_reduction <maximumf>, %13, %cst_11 [0] : vector<10x2xf32> to vector<2xf32>
    %15 = vector.shape_cast %14 : vector<2xf32> to vector<1x2xf32>
    %16 = vector.broadcast %15 : vector<1x2xf32> to vector<10x2xf32>
    %17 = arith.subf %13, %16 : vector<10x2xf32>
    %18 = math.exp %17 : vector<10x2xf32>
    %cst_12 = arith.constant dense<0.000000e+00> : vector<2xf32>
    %19 = vector.multi_reduction <add>, %18, %cst_12 [0] : vector<10x2xf32> to vector<2xf32>
    %20 = vector.shape_cast %19 : vector<2xf32> to vector<1x2xf32>
    %21 = math.log %20 : vector<1x2xf32>
    %22 = vector.broadcast %21 : vector<1x2xf32> to vector<10x2xf32>
    %23 = arith.subf %17, %22 : vector<10x2xf32>
    %c0_13 = arith.constant 0 : index
    %c0_14 = arith.constant 0 : index
    %24 = vector.load %arg6[%c0_13, %c0_14] : memref<10x2xf32, #tpu.memory_space<vmem>>, vector<10x2xf32>
    tpu.vector_store %arg6[%c0_13, %c0_14], %23 {strides = array<i32>} : memref<10x2xf32, #tpu.memory_space<vmem>>, vector<10x2xf32>,
    return
  }
  func.func @transform_0(%arg0: i32) -> (i32, i32) {
    %c0_i32 = arith.constant 0 : i32
    %c0_i32_0 = arith.constant 0 : i32
    return %c0_i32, %arg0 : i32, i32
  }
  func.func @transform_1(%arg0: i32) -> (i32, i32) {
    %c0_i32 = arith.constant 0 : i32
    %c0_i32_0 = arith.constant 0 : i32
    %c0_i32_1 = arith.constant 0 : i32
    return %c0_i32, %c0_i32_0 : i32, i32
  }
  func.func @transform_2(%arg0: i32) -> (i32, i32) {
    %c0_i32 = arith.constant 0 : i32
    %c0_i32_0 = arith.constant 0 : i32
    %c0_i32_1 = arith.constant 0 : i32
    return %c0_i32, %c0_i32_0 : i32, i32
  }
  func.func @transform_3(%arg0: i32) -> (i32, i32) {
    %c0_i32 = arith.constant 0 : i32
    %c0_i32_0 = arith.constant 0 : i32
    %c0_i32_1 = arith.constant 0 : i32
    return %c0_i32, %c0_i32_0 : i32, i32
  }
  func.func @transform_4(%arg0: i32) -> (i32, i32) {
    %c0_i32 = arith.constant 0 : i32
    %c0_i32_0 = arith.constant 0 : i32
    %c0_i32_1 = arith.constant 0 : i32
    return %c0_i32, %c0_i32_0 : i32, i32
  }
  func.func @transform_5(%arg0: i32) -> (i32, i32) {
    %c0_i32 = arith.constant 0 : i32
    %c0_i32_0 = arith.constant 0 : i32
    return %c0_i32, %arg0 : i32, i32
  }
}

</mosaic_0001>

<bundles_post_ra>
// kernel: net_forward.3
= control target key start
LH: loop header
LB: loop body
LE: loop exit
PB: predicated region body
PF: predicated region fallthrough
CT: control target
= control target key end

     0   :  { %s865_s12 = smov 0   ;;  %s867_s13 = smov 0   ;;  %s978_s0 = inlined_call_operand.vmem [shape: bf16[10,25], index: 0, kind: input, shape index: {}]   ;;  %s979_s1 = inlined_call_operand.vmem [shape: bf16[4,25,392], index: 1, kind: input, shape index: {}]   ;;  %s980_s2 = inlined_call_operand.vmem [shape: f32[10,1], index: 2, kind: input, shape index: {}]   ;;  %s981_s3 = inlined_call_operand.vmem [shape: bf16[10,392], index: 3, kind: output, shape index: {}]  }
   0x1   :  { %s869_s14 = smov 0  }
   0x2 LB: > { %s713_s15 = sadd.s32 4294967295, %s841_s14   ;;  %s882_s16 = sadd.s32 1, %s841_s14   ;;  %s841_s14 = sphi %s869_s14, %s985_s14   ;;  %s837_s13 = sphi %s867_s13, %s984_s13   ;;  %s833_s12 = sphi %s865_s12, %s983_s12  }
   0x3   : > { %s38_s17 = ssub.s32 %s841_s14, %s882_s16  ;;  %s41_s18 = sadd.s32 1, %s837_s13 }
   0x4   : > { %p39_p0 = scmp.eq.s32.totalorder %s38_s17, 0  ;;  %p48_p1 = scmp.ne.s32.totalorder %s837_s13, %s833_s12 }
   0x5   : > { %p49_p2 = scmp.eq.s32.totalorder %s841_s14, 0  ;;  %p99_p3 = scmp.eq.s32.totalorder %s713_s15, 1 }
   0x6   : > { %s893_s19 = scalar_select %p39_p0, %s837_s13, %s41_s18  }
   0x7   : > { %p50_p4 = por %p49_p2, %p48_p1  ;;  %p895_p5 = por %p99_p3, %p48_p1 }
   0x8   : > { %p716_p6 = scmp.ge.s32.totalorder %s841_s14, 2 }
   0xa   : > { %127 = sbr.rel (%p716_p6) target bundleno = 29 (0x1d), region = 24 }
  0x11   : > { %130 = sbr.rel (!%p50_p4) target bundleno = 29 (0x1d), region = 28  ;;  %s132_s21 = sand.u32 (%p50_p4), 1, %s837_s13  }
  0x12   : > { %s763_s22 = sshll.u32 (%p50_p4), %s841_s14, 3  ;;  %s717_s23 = sshll.u32 (%p50_p4), %s132_s21, 7 }
  0x13   : > { %s905_s26 = scalar_lea.vmem (%p50_p4), %s979_s1, %s763_s22  ;;  %s134_s27 = scalar_lea.vmem (%p50_p4), [#allocation2], %s717_s23 }
  0x14   : > { %v195_v0 = vld [vmem:[%s905_s26] sm:$0xff] (%p50_p4)  ;;  %v197_v1 = vld [vmem:[%s905_s26 + $0x10] sm:$0xff] (%p50_p4) }
  0x15   : > { %v199_v2 = vld [vmem:[%s905_s26 + $0x20] sm:$0xff] (%p50_p4)  ;;  %196 = vst [vmem:[%s134_s27] sm:$0xff] (%p50_p4), %v195_v0  ;;  %198 = vst [vmem:[%s134_s27 + $0x8] sm:$0xff] (%p50_p4), %v197_v1  ;;  %v201_v3 = vld [vmem:[%s905_s26 + $0x30] sm:$0xff] (%p50_p4) }
  0x16   : > { %200 = vst [vmem:[%s134_s27 + $0x10] sm:$0xff] (%p50_p4), %v199_v2  ;;  %v203_v4 = vld [vmem:[%s905_s26 + $0x40] sm:$0xff] (%p50_p4)  ;;  %v205_v5 = vld [vmem:[%s905_s26 + $0x50] sm:$0xff] (%p50_p4)  ;;  %202 = vst [vmem:[%s134_s27 + $0x18] sm:$0xff] (%p50_p4), %v201_v3 }
  0x17   : > { %204 = vst [vmem:[%s134_s27 + $0x20] sm:$0xff] (%p50_p4), %v203_v4  ;;  %206 = vst [vmem:[%s134_s27 + $0x28] sm:$0xff] (%p50_p4), %v205_v5  ;;  %v207_v6 = vld [vmem:[%s905_s26 + $0x60] sm:$0xff] (%p50_p4)  ;;  %v209_v7 = vld [vmem:[%s905_s26 + $0x70] sm:$0xff] (%p50_p4) }
  0x18   : > { %v211_v8 = vld [vmem:[%s905_s26 + $0x80] sm:$0xff]  ;;  %208 = vst [vmem:[%s134_s27 + $0x30] sm:$0xff] %v207_v6  ;;  %210 = vst [vmem:[%s134_s27 + $0x38] sm:$0xff] %v209_v7  ;;  %v213_v9 = vld [vmem:[%s905_s26 + $0x90] sm:$0xff] }
  0x19   : > { %212 = vst [vmem:[%s134_s27 + $0x40] sm:$0xff] %v211_v8  ;;  %v215_v10 = vld [vmem:[%s905_s26 + $0xa0] sm:$0xff]  ;;  %v217_v11 = vld [vmem:[%s905_s26 + $0xb0] sm:$0xff]  ;;  %214 = vst [vmem:[%s134_s27 + $0x48] sm:$0xff] %v213_v9 }
  0x1a   : > { %216 = vst [vmem:[%s134_s27 + $0x50] sm:$0xff] %v215_v10  ;;  %218 = vst [vmem:[%s134_s27 + $0x58] sm:$0xff] %v217_v11  ;;  %v219_v12 = vld [vmem:[%s905_s26 + $0xc0] sm:$0xff]  ;;  %v221_v13 = vld [vmem:[%s905_s26 + $0xd0] sm:$0xff] }
  0x1b   : > { %v223_v14 = vld [vmem:[%s905_s26 + $0xe0] sm:$0xff]  ;;  %220 = vst [vmem:[%s134_s27 + $0x60] sm:$0xff] %v219_v12  ;;  %222 = vst [vmem:[%s134_s27 + $0x68] sm:$0xff] %v221_v13  ;;  %v225_v15 = vld [vmem:[%s905_s26 + $0xf0] sm:$0xff] }
  0x1c   : > { %224 = vst [vmem:[%s134_s27 + $0x70] sm:$0xff] %v223_v14  ;;  %226 = vst [vmem:[%s134_s27 + $0x78] sm:$0xff] %v225_v15 }
  0x1d PF: > { %p720_p7 = scmp.ge.s32.totalorder %s841_s14, 1  ;;  %p231_p8 = scmp.lt.s32.totalorder %s841_s14, 3 }
  0x1f   : > { %p232_p9 = pnand %p720_p7, %p231_p8 }
  0x20   : > { %s238_s28 = sand.u32 (!%p232_p9), 1, %s833_s12   ;;  %vm296_vm0 = vcmask (!%p232_p9), 1043456   ;;  %v577_v16 = vld [vmem:[%s980_s2] sm:$0xff] (!%p232_p9)  ;;  %v843_v17 = vmov (!%p232_p9), 0   ;;  %vm297_vm1 = vcmask (!%p232_p9), 1044480   ;;  %v844_v18 = vmov (!%p232_p9), 65535  }
  0x21   : > { %235 = sbr.rel (%p232_p9) target bundleno = 286 (0x11e), region = 66  ;;  %s721_s4 = sshll.u32 (!%p232_p9), %s238_s28, 7  ;;  %338 = vmatprep.mubr.bf16.mxu0 (!%p232_p9), %v843_v17  ;;  %410 = vmatprep.mubr.bf16.mxu1 (!%p232_p9), %v843_v17  ;;  %v298_v19 = vsel (!%p232_p9), %vm296_vm0, 4294967295, %v844_v18  ;;  %v806_v31 = vld [vmem:[%s978_s0] sm:$0x1f] (!%p232_p9)   ;;  %vm292_vm2 = vcmask (!%p232_p9), 203776  }
  0x22   : > { %793 = vset.pattern.permute.xlu0 (!%p232_p9), %v843_v17  ;;  %s931_s5 = scalar_lea.vmem (!%p232_p9), [#allocation2], %s721_s4  ;;  %v299_v24 = vsel (!%p232_p9), %vm297_vm1, %v298_v19, 0  ;;  %v578_v46 = vld [vmem:[%s980_s2 + $0x8] sm:$0x3] (!%p232_p9)  ;;  %s722_s10 = sshll.u32 (!%p232_p9), %s238_s28, 4 }
  0x23   : > { %v794_v20 = vld [vmem:[%s931_s5 + $0x4] ss:$8 sps:$4 sm:$0xff] (!%p232_p9)   ;;  %581 = vperm.xlu0 (!%p232_p9), %793, %v577_v16   ;;  %v798_v22 = vld [vmem:[%s931_s5] ss:$8 sps:$4 sm:$0xff] (!%p232_p9)   ;;  %s259_s11 = scalar_lea.vmem (!%p232_p9), [#allocation3], %s722_s10 }
  0x24   : > { %v796_v21 = vld [vmem:[%s931_s5 + $0x24] ss:$8 sps:$4 sm:$0xff] (!%p232_p9)   ;;  %306 = vmatprep.subr.bf16.mxu0 (!%p232_p9), %v794_v20  ;;  %v799_v23 = vld [vmem:[%s931_s5 + $0x20] ss:$8 sps:$4 sm:$0xff] (!%p232_p9)  }
  0x25   : > { %378 = vmatprep.subr.bf16.mxu1 (!%p232_p9), %v796_v21  ;;  %v800_v25 = vld [vmem:[%s931_s5 + $0x14] ss:$8 sps:$4 sm:$0x1f] (!%p232_p9)   ;;  %307 = vmatpush1.bf16.msra.mxu0 (!%p232_p9), %v798_v22  ;;  %v804_v28 = vld [vmem:[%s931_s5 + $0x10] ss:$8 sps:$4 sm:$0x1f] (!%p232_p9)  }
  0x26   : > { %379 = vmatpush1.bf16.msra.mxu1 (!%p232_p9), %v799_v23  ;;  %v802_v26 = vld [vmem:[%s931_s5 + $0x34] ss:$8 sps:$4 sm:$0x1f] (!%p232_p9)   ;;  %v304_v27 = vand.u32 (!%p232_p9), %v800_v25, %v299_v24  ;;  %v805_v29 = vld [vmem:[%s931_s5 + $0x30] ss:$8 sps:$4 sm:$0x1f] (!%p232_p9)   ;;  %v301_v33 = vand.u32 (!%p232_p9), %v804_v28, %v299_v24 }
  0x27   : > { %v376_v30 = vand.u32 (!%p232_p9), %v802_v26, %v299_v24  ;;  %v809_v32 = vld [vmem:[%s931_s5 + $0x44] ss:$8 sps:$4 sm:$0xff] (!%p232_p9)   ;;  %v373_v34 = vand.u32 (!%p232_p9), %v805_v29, %v299_v24  ;;  %v807_v35 = vld [vmem:[%s931_s5 + $0x40] ss:$8 sps:$4 sm:$0xff] (!%p232_p9)   ;;  %586 = vperm.xlu0 (!%p232_p9), %793, %v578_v46  }
  0x28   : > { %308 = vmatprep.subr.bf16.mxu0 %v304_v27  ;;  %v810_v36 = vld [vmem:[%s931_s5 + $0x60] ss:$8 sps:$4 sm:$0xff]   ;;  %v812_v37 = vld [vmem:[%s931_s5 + $0x64] ss:$8 sps:$4 sm:$0xff]   ;;  %s766_s17 = sshll.u32 (%p895_p5), %s713_s15, 3 }
  0x29   : > { %380 = vmatprep.subr.bf16.mxu1 %v376_v30  ;;  %309 = vmatpush1.bf16.msra.mxu0 %v301_v33  ;;  %v813_v38 = vld [vmem:[%s931_s5 + $0x50] ss:$8 sps:$4 sm:$0x1f]   ;;  %v815_v39 = vld [vmem:[%s931_s5 + $0x54] ss:$8 sps:$4 sm:$0x1f]   ;;  %s620_s21 = scalar_lea.vmem (%p895_p5), %s981_s3, %s766_s17 }
  0x2a   : > { %381 = vmatpush1.bf16.msra.mxu1 %v373_v34  ;;  %454 = vmatprep.subr.bf16.mxu0 %v809_v32  ;;  %v816_v40 = vld [vmem:[%s931_s5 + $0x70] ss:$8 sps:$4 sm:$0x1f]   ;;  %v452_v41 = vand.u32 %v815_v39, %v299_v24  ;;  %v818_v42 = vld [vmem:[%s931_s5 + $0x74] ss:$8 sps:$4 sm:$0x1f]   ;;  %v449_v44 = vand.u32 %v813_v38, %v299_v24 }
  0x2b   : > { %530 = vmatprep.subr.bf16.mxu1 %v812_v37  ;;  %v528_v43 = vand.u32 %v818_v42, %v299_v24  ;;  %v525_v45 = vand.u32 %v816_v40, %v299_v24 }
  0x2c   : > { %728 = vmatmul.mubr.msk.bf16.vlgmr.msra.gmra.mrb[0].mxu0 %vm292_vm2, %v806_v31 }
  0x2d   : > { %737 = vmatmul.mubr.msk.bf16.vlgmr.msra.gmra.mrb[0].mxu1 %vm292_vm2, %v806_v31  ;;  %455 = vmatpush1.bf16.msra.mxu0 %v807_v35 }
  0x2e   : > { %531 = vmatpush1.bf16.msra.mxu1 %v810_v36  ;;  %456 = vmatprep.subr.bf16.mxu0 %v452_v41 }
  0x2f   : > { %486 = vmatprep.mubr.bf16.mxu0 %v843_v17  ;;  %532 = vmatprep.subr.bf16.mxu1 %v528_v43 }
  0x30   : > { %562 = vmatprep.mubr.bf16.mxu1 %v843_v17 }
  0x31   : > { %457 = vmatpush1.bf16.msra.mxu0 %v449_v44 }
  0x32   : > { %533 = vmatpush1.bf16.msra.mxu1 %v525_v45 }
  0x34   : > { %746 = vmatmul.mubr.msk.bf16.vlgmr.msra.gmra.mrb[4].mxu0 %vm292_vm2, %v806_v31 }
  0x35   : > { %755 = vmatmul.mubr.msk.bf16.vlgmr.msra.gmra.mrb[4].mxu1 %vm292_vm2, %v806_v31 }
  0xa2   : > { %v582_v59 = vpop.permute.xlu0 %581 }
  0xa6   : > { %v587_v14 = vpop.permute.xlu0 %586 }
  0xff   : > { %v340_v47 = vpop.f32.mrb[0].mxu0 }
 0x100   : > { %v412_v48 = vpop.f32.mrb[0].mxu1  ;;  %v342_v50 = vpop.f32.mrb[1].mxu0 }
 0x101   : > { %v421_v49 = vmax.f32 %v340_v47, %v412_v48  ;;  %v414_v51 = vpop.f32.mrb[1].mxu1  ;;  %v344_v53 = vpop.f32.mrb[2].mxu0 }
 0x102   : > { %v422_v52 = vmax.f32 %v342_v50, %v414_v51  ;;  %v416_v54 = vpop.f32.mrb[2].mxu1  ;;  %v346_v56 = vpop.f32.mrb[3].mxu0 }
 0x103   : > { %v423_v55 = vmax.f32 %v344_v53, %v416_v54  ;;  %v418_v57 = vpop.f32.mrb[3].mxu1 }
 0x104   : > { %v424_v58 = vmax.f32 %v346_v56, %v418_v57 }
 0x107   : > { %v488_v60 = vpop.f32.mrb[4].mxu0 }
 0x108   : > { %v564_v61 = vpop.f32.mrb[4].mxu1  ;;  %v497_v62 = vmax.f32 %v421_v49, %v488_v60  ;;  %v490_v63 = vpop.f32.mrb[5].mxu0 }
 0x109   : > { %v566_v0 = vpop.f32.mrb[5].mxu1  ;;  %v498_v1 = vmax.f32 %v422_v52, %v490_v63  ;;  %v492_v2 = vpop.f32.mrb[6].mxu0 }
 0x10a   : > { %v568_v3 = vpop.f32.mrb[6].mxu1  ;;  %v573_v4 = vmax.f32 %v497_v62, %v564_v61  ;;  %v499_v5 = vmax.f32 %v423_v55, %v492_v2  ;;  %v494_v6 = vpop.f32.mrb[7].mxu0 }
 0x10b   : > { %v570_v7 = vpop.f32.mrb[7].mxu1  ;;  %v574_v8 = vmax.f32 %v498_v1, %v566_v0  ;;  %v500_v9 = vmax.f32 %v424_v58, %v494_v6 }
 0x10c   : > { %v589_v10 = vadd.f32 %v582_v59, %v573_v4  ;;  %v575_v11 = vmax.f32 %v499_v5, %v568_v3 }
 0x10d   : > { %v590_v12 = vadd.f32 %v582_v59, %v574_v8  ;;  %v576_v13 = vmax.f32 %v500_v9, %v570_v7 }
 0x10e   : > { %v593_v15 = vmax.f32 %v589_v10, 0.0  ;;  %v591_v16 = vadd.f32 %v587_v14, %v575_v11 }
 0x10f   : > { %v594_v17 = vmax.f32 %v590_v12, 0.0  ;;  %v592_v18 = vadd.f32 %v587_v14, %v576_v13  ;;  %617 = sbr.rel (!%p895_p5) target bundleno = 286 (0x11e), region = 74 }
 0x110   : > { %v595_v19 = vmax.f32 %v591_v16, 0.0 }
 0x111   : > { %v764_v20 = vpack.c.bf16 %v594_v17, %v593_v15  ;;  %v596_v21 = vmax.f32 %v592_v18, 0.0 }
 0x113   : > { %v765_v22 = vpack.c.bf16 %v596_v21, %v595_v19  ;;  %609 = vst [vmem:[%s259_s11] sm:$0xff] %v764_v20 }
 0x115   : > { %610 = vst [vmem:[%s259_s11 + $0x8] sm:$0x11] %v765_v22 }
 0x11a   : > { %v650_v23 = vld [vmem:[%s259_s11] sm:$0xff] }
 0x11b   : > { %651 = vst [vmem:[%s620_s21] sm:$0xff] %v650_v23 }
 0x11c   : > { %v652_v24 = vld [vmem:[%s259_s11 + $0x8] sm:$0xff] }
 0x11d   : > { %653 = vst [vmem:[%s620_s21 + $0x10] sm:$0xff] %v652_v24 }
 0x11e PF: > { %p10_p10 = scmp.ge.s32.totalorder %s882_s16, 4   ;;  %s983_s12 = smov %s837_s13 }
 0x11f   : > { %s984_s13 = smov %s893_s19  ;;  %s985_s14 = smov %s882_s16 }
 0x120   :  { %12 = sbr.rel (!%p10_p10) target bundleno = 2 (0x2), region = 146 }

// kernel: net_forward.4
= control target key start
LH: loop header
LB: loop body
LE: loop exit
PB: predicated region body
PF: predicated region fallthrough
CT: control target
= control target key end

     0   :  { %v1177_v1 = vmov 0   ;;  %vm167_vm0 = vcmask 1044480   ;;  %vm160_vm1 = vcmask 998400   ;;  %vm802_vm2 = vcmask 404480   ;;  %s1441_s1 = inlined_call_operand.vmem [shape: bf16[4,250,50], index: 1, kind: input, shape index: {}]   ;;  %s1442_s0 = inlined_call_operand.vmem [shape: bf16[20,250], index: 0, kind: input, shape index: {}]   ;;  %s1443_s2 = inlined_call_operand.vmem [shape: f32[20,1], index: 2, kind: input, shape index: {}]   ;;  %s1444_s3 = inlined_call_operand.vmem [shape: bf16[20,50], index: 3, kind: output, shape index: {}]  }
   0x1   :  { %v1108_v0 = vld [vmem:[%s1441_s1 + $0x40] sm:$0xff]   ;;  %1106 = vset.pattern.permute.xlu0 %v1177_v1  ;;  %1107 = vset.pattern.permute.xlu1 %v1177_v1  ;;  %v1112_v5 = vld [vmem:[%s1441_s1 + $0x48] sm:$0xff]   ;;  %v1116_v9 = vld [vmem:[%s1441_s1 + $0x50] sm:$0xff]   ;;  %vm805_vm3 = vcmask 402432  }
   0x2   :  { %v1109_v2 = vld [vmem:[%s1441_s1 + $0xc0] sm:$0xff]   ;;  %989 = vmatprep.subr.bf16.mxu0 %v1108_v0  ;;  %v1113_v6 = vld [vmem:[%s1441_s1 + $0xc8] sm:$0xff]   ;;  %v1117_v10 = vld [vmem:[%s1441_s1 + $0xd0] sm:$0xff]  }
   0x3   :  { %v1110_v3 = vld [vmem:[%s1441_s1] sm:$0xff]   ;;  %1017 = vmatprep.subr.bf16.mxu1 %v1109_v2  ;;  %v1114_v7 = vld [vmem:[%s1441_s1 + $0x8] sm:$0xff]   ;;  %v1118_v11 = vld [vmem:[%s1441_s1 + $0x10] sm:$0xff]  }
   0x4   :  { %v1111_v4 = vld [vmem:[%s1441_s1 + $0x80] sm:$0xff]   ;;  %990 = vmatpush3.bf16.msra.mxu0 %v1110_v3  ;;  %v1115_v8 = vld [vmem:[%s1441_s1 + $0x88] sm:$0xff]   ;;  %v1119_v12 = vld [vmem:[%s1441_s1 + $0x90] sm:$0xff]  }
   0x5   :  { %1018 = vmatpush3.bf16.msra.mxu1 %v1111_v4  ;;  %991 = vmatprep.subr.bf16.mxu0 %v1112_v5  ;;  %v1120_v13 = vld [vmem:[%s1441_s1 + $0x58] sm:$0xff]   ;;  %v1124_v17 = vld [vmem:[%s1441_s1 + $0x60] sm:$0xff]   ;;  %v1128_v21 = vld [vmem:[%s1441_s1 + $0x68] sm:$0xff]  }
   0x6   :  { %1019 = vmatprep.subr.bf16.mxu1 %v1113_v6  ;;  %v1121_v14 = vld [vmem:[%s1441_s1 + $0xd8] sm:$0xff]   ;;  %v1125_v18 = vld [vmem:[%s1441_s1 + $0xe0] sm:$0xff]   ;;  %v1129_v22 = vld [vmem:[%s1441_s1 + $0xe8] sm:$0xff]  }
   0x7   :  { %v1122_v15 = vld [vmem:[%s1441_s1 + $0x18] sm:$0xff]   ;;  %v1126_v19 = vld [vmem:[%s1441_s1 + $0x20] sm:$0xff]   ;;  %v1130_v23 = vld [vmem:[%s1441_s1 + $0x28] sm:$0xff]  }
   0x8   :  { %992 = vmatpush3.bf16.msra.mxu0 %v1114_v7  ;;  %v1123_v16 = vld [vmem:[%s1441_s1 + $0x98] sm:$0xff]   ;;  %v1127_v20 = vld [vmem:[%s1441_s1 + $0xa0] sm:$0xff]   ;;  %v1131_v24 = vld [vmem:[%s1441_s1 + $0xa8] sm:$0xff]  }
   0x9   :  { %1020 = vmatpush3.bf16.msra.mxu1 %v1115_v8  ;;  %993 = vmatprep.subr.bf16.mxu0 %v1116_v9  ;;  %v1132_v25 = vld [vmem:[%s1441_s1 + $0x70] sm:$0xff]   ;;  %v1136_v29 = vld [vmem:[%s1441_s1 + $0x78] sm:$0x1f]   ;;  %v1299_v33 = vld [vmem:[%s1442_s0 + $0x4] ss:$8 sps:$4 sm:$0xff]  }
   0xa   :  { %1021 = vmatprep.subr.bf16.mxu1 %v1117_v10  ;;  %v1133_v26 = vld [vmem:[%s1441_s1 + $0xf0] sm:$0xff]   ;;  %v1137_v30 = vld [vmem:[%s1441_s1 + $0xf8] sm:$0x1f]   ;;  %v1304_v34 = vld [vmem:[%s1442_s0] ss:$8 sps:$4 sm:$0xff]   ;;  %831 = vmatprep.mubr.msk.bf16.mxu0 %vm160_vm1, %v1299_v33 }
   0xb   :  { %v1134_v27 = vld [vmem:[%s1441_s1 + $0x30] sm:$0xff]   ;;  %v1138_v31 = vld [vmem:[%s1441_s1 + $0x38] sm:$0xff]   ;;  %881 = vmatprep.mubr.msk.bf16.mxu1 %vm160_vm1, %v1299_v33  ;;  %v1143_v35 = vld [vmem:[%s1441_s1 + $0x140] sm:$0xff]  }
   0xc   :  { %994 = vmatpush3.bf16.msra.mxu0 %v1118_v11  ;;  %v1135_v28 = vld [vmem:[%s1441_s1 + $0xb0] sm:$0xff]   ;;  %v1139_v32 = vld [vmem:[%s1441_s1 + $0xb8] sm:$0xff]   ;;  %v1144_v36 = vld [vmem:[%s1441_s1 + $0x1c0] sm:$0xff]  }
   0xd   :  { %1022 = vmatpush3.bf16.msra.mxu1 %v1119_v12  ;;  %995 = vmatprep.subr.bf16.mxu0 %v1120_v13  ;;  %v1145_v37 = vld [vmem:[%s1441_s1 + $0x100] sm:$0xff]   ;;  %v1147_v39 = vld [vmem:[%s1441_s1 + $0x148] sm:$0xff]   ;;  %v1151_v43 = vld [vmem:[%s1441_s1 + $0x150] sm:$0xff]  }
   0xe   :  { %1023 = vmatprep.subr.bf16.mxu1 %v1121_v14  ;;  %v1146_v38 = vld [vmem:[%s1441_s1 + $0x180] sm:$0xff]   ;;  %v1148_v40 = vld [vmem:[%s1441_s1 + $0x1c8] sm:$0xff]   ;;  %v1152_v44 = vld [vmem:[%s1441_s1 + $0x1d0] sm:$0xff]  }
   0xf   :  { %v1149_v41 = vld [vmem:[%s1441_s1 + $0x108] sm:$0xff]   ;;  %v1153_v45 = vld [vmem:[%s1441_s1 + $0x110] sm:$0xff]   ;;  %v1155_v47 = vld [vmem:[%s1441_s1 + $0x158] sm:$0xff]  }
  0x10   :  { %996 = vmatpush3.bf16.msra.mxu0 %v1122_v15  ;;  %v1150_v42 = vld [vmem:[%s1441_s1 + $0x188] sm:$0xff]   ;;  %v1154_v46 = vld [vmem:[%s1441_s1 + $0x190] sm:$0xff]   ;;  %v1156_v48 = vld [vmem:[%s1441_s1 + $0x1d8] sm:$0xff]  }
  0x11   :  { %1024 = vmatpush3.bf16.msra.mxu1 %v1123_v16  ;;  %997 = vmatprep.subr.bf16.mxu0 %v1124_v17  ;;  %v1157_v49 = vld [vmem:[%s1441_s1 + $0x118] sm:$0xff]   ;;  %v1159_v51 = vld [vmem:[%s1441_s1 + $0x160] sm:$0xff]   ;;  %v17_v55 = vld [vmem:[%s1442_s0 + $0x10] sm:$0x33] }
  0x12   :  { %1025 = vmatprep.subr.bf16.mxu1 %v1125_v18  ;;  %v1158_v50 = vld [vmem:[%s1441_s1 + $0x198] sm:$0xff]   ;;  %v1160_v52 = vld [vmem:[%s1441_s1 + $0x1e0] sm:$0xff]   ;;  %v814_v56 = vcombine.high %v17_v55, %v17_v55  ;;  %v1164_v57 = vld [vmem:[%s1441_s1 + $0x168] sm:$0xff]   ;;  %v813_v58 = vcombine.low %v17_v55, %v17_v55 }
  0x13   :  { %v1161_v53 = vld [vmem:[%s1441_s1 + $0x120] sm:$0xff]   ;;  %v1165_v59 = vld [vmem:[%s1441_s1 + $0x1e8] sm:$0xff]   ;;  %v1169_v62 = vld [vmem:[%s1441_s1 + $0x170] sm:$0xff]  }
  0x14   :  { %998 = vmatpush3.bf16.msra.mxu0 %v1126_v19  ;;  %v1162_v54 = vld [vmem:[%s1441_s1 + $0x1a0] sm:$0xff]   ;;  %v1167_v60 = vld [vmem:[%s1441_s1 + $0x128] sm:$0xff]   ;;  %v1170_v63 = vld [vmem:[%s1441_s1 + $0x1f0] sm:$0xff]  }
  0x15   :  { %1026 = vmatpush3.bf16.msra.mxu1 %v1127_v20  ;;  %999 = vmatprep.subr.bf16.mxu0 %v1128_v21  ;;  %v1168_v61 = vld [vmem:[%s1441_s1 + $0x1a8] sm:$0xff]   ;;  %v1171_v0 = vld [vmem:[%s1441_s1 + $0x130] sm:$0xff]   ;;  %v1173_v2 = vld [vmem:[%s1441_s1 + $0x178] sm:$0x1f]  }
  0x16   :  { %1027 = vmatprep.subr.bf16.mxu1 %v1129_v22  ;;  %v1172_v1 = vld [vmem:[%s1441_s1 + $0x1b0] sm:$0xff]   ;;  %v1174_v3 = vld [vmem:[%s1441_s1 + $0x1f8] sm:$0x1f]   ;;  %v765_v6 = vld [vmem:[%s1443_s2] sm:$0xff] }
  0x17   :  { %v1175_v4 = vld [vmem:[%s1441_s1 + $0x138] sm:$0xff]   ;;  %770 = vperm.xlu0 %1106, %v765_v6   ;;  %v767_v7 = vld [vmem:[%s1443_s2 + $0x10] sm:$0xf]  ;;  %v766_v8 = vld [vmem:[%s1443_s2 + $0x8] sm:$0xff] }
  0x18   :  { %1000 = vmatpush3.bf16.msra.mxu0 %v1130_v23  ;;  %v1176_v5 = vld [vmem:[%s1441_s1 + $0x1b8] sm:$0xff]   ;;  %780 = vperm.xlu1 %1107, %v767_v7  }
  0x19   :  { %1028 = vmatpush3.bf16.msra.mxu1 %v1131_v24  ;;  %1001 = vmatprep.subr.bf16.mxu0 %v1132_v25 }
  0x1a   :  { %1029 = vmatprep.subr.bf16.mxu1 %v1133_v26 }
  0x1b   :  { %775 = vperm.xlu0 %1106, %v766_v8  }
  0x1c   :  { %1002 = vmatpush3.bf16.msra.mxu0 %v1134_v27 }
  0x1d   :  { %1030 = vmatpush3.bf16.msra.mxu1 %v1135_v28  ;;  %1101 = vmatprep.subr.msk.bf16.mxu0 %vm167_vm0, %v1136_v29 }
  0x1e   :  { %1102 = vmatprep.subr.msk.bf16.mxu1 %vm167_vm0, %v1137_v30 }
  0x20   :  { %1004 = vmatpush3.bf16.msra.mxu0 %v1138_v31 }
  0x21   :  { %1032 = vmatpush3.bf16.msra.mxu1 %v1139_v32  ;;  %1045 = vmatprep.subr.bf16.mxu0 %v1143_v35 }
  0x22   :  { %1073 = vmatprep.subr.bf16.mxu1 %v1144_v36 }
  0x23   :  { %204 = vmatmul.mubr.bf16.vlgmr.msra.gmra.mrb[0].mxu0 %v1304_v34 }
  0x24   :  { %383 = vmatmul.mubr.bf16.vlgmr.msra.gmra.mrb[0].mxu1 %v1304_v34  ;;  %1046 = vmatpush3.bf16.msra.mxu0 %v1145_v37 }
  0x25   :  { %1074 = vmatpush3.bf16.msra.mxu1 %v1146_v38  ;;  %1047 = vmatprep.subr.bf16.mxu0 %v1147_v39 }
  0x26   :  { %1075 = vmatprep.subr.bf16.mxu1 %v1148_v40  ;;  %832 = vmatprep.mubr.msk.bf16.mxu0 %vm160_vm1, %v814_v56 }
  0x27   :  { %882 = vmatprep.mubr.msk.bf16.mxu1 %vm160_vm1, %v814_v56 }
  0x28   :  { %1048 = vmatpush3.bf16.msra.mxu0 %v1149_v41 }
  0x29   :  { %1076 = vmatpush3.bf16.msra.mxu1 %v1150_v42  ;;  %1049 = vmatprep.subr.bf16.mxu0 %v1151_v43 }
  0x2a   :  { %1077 = vmatprep.subr.bf16.mxu1 %v1152_v44 }
  0x2b   :  { %212 = vmatmul.mubr.bf16.gmra.mrb[4].mxu0 %v813_v58 }
  0x2c   :  { %1050 = vmatpush3.bf16.msra.mxu0 %v1153_v45  ;;  %931 = vmatprep.mubr.msk.bf16.mxu0 %vm160_vm1, %v1299_v33 }
  0x2d   :  { %1078 = vmatpush3.bf16.msra.mxu1 %v1154_v46  ;;  %1051 = vmatprep.subr.bf16.mxu0 %v1155_v47 }
  0x2e   :  { %1079 = vmatprep.subr.bf16.mxu1 %v1156_v48  ;;  %391 = vmatmul.mubr.bf16.gmra.mrb[4].mxu1 %v813_v58 }
  0x2f   :  { %981 = vmatprep.mubr.msk.bf16.mxu1 %vm160_vm1, %v1299_v33 }
  0x30   :  { %1052 = vmatpush3.bf16.msra.mxu0 %v1157_v49 }
  0x31   :  { %1080 = vmatpush3.bf16.msra.mxu1 %v1158_v50  ;;  %1053 = vmatprep.subr.bf16.mxu0 %v1159_v51 }
  0x32   :  { %1081 = vmatprep.subr.bf16.mxu1 %v1160_v52 }
  0x34   :  { %1054 = vmatpush3.bf16.msra.mxu0 %v1161_v53 }
  0x35   :  { %1082 = vmatpush3.bf16.msra.mxu1 %v1162_v54  ;;  %1055 = vmatprep.subr.bf16.mxu0 %v1164_v57 }
  0x36   :  { %1083 = vmatprep.subr.bf16.mxu1 %v1165_v59 }
  0x38   :  { %1056 = vmatpush3.bf16.msra.mxu0 %v1167_v60 }
  0x39   :  { %1084 = vmatpush3.bf16.msra.mxu1 %v1168_v61  ;;  %1057 = vmatprep.subr.bf16.mxu0 %v1169_v62 }
  0x3a   :  { %1085 = vmatprep.subr.bf16.mxu1 %v1170_v63 }
  0x3c   :  { %1058 = vmatpush3.bf16.msra.mxu0 %v1171_v0 }
  0x3d   :  { %1086 = vmatpush3.bf16.msra.mxu1 %v1172_v1  ;;  %1103 = vmatprep.subr.msk.bf16.mxu0 %vm167_vm0, %v1173_v2 }
  0x3e   :  { %1104 = vmatprep.subr.msk.bf16.mxu1 %vm167_vm0, %v1174_v3 }
  0x40   :  { %1060 = vmatpush3.bf16.msra.mxu0 %v1175_v4 }
  0x41   :  { %1088 = vmatpush3.bf16.msra.mxu1 %v1176_v5 }
  0x43   :  { %565 = vmatmul.mubr.bf16.vlgmr.msra.gmra.mrb[8].mxu0 %v1304_v34 }
  0x44   :  { %747 = vmatmul.mubr.bf16.vlgmr.msra.gmra.mrb[8].mxu1 %v1304_v34  ;;  %932 = vmatprep.mubr.msk.bf16.mxu0 %vm160_vm1, %v814_v56 }
  0x45   :  { %982 = vmatprep.mubr.msk.bf16.mxu1 %vm160_vm1, %v814_v56 }
  0x4b   :  { %573 = vmatmul.mubr.bf16.gmra.mrb[12].mxu0 %v813_v58 }
  0x4c   :  { %755 = vmatmul.mubr.bf16.gmra.mrb[12].mxu1 %v813_v58 }
  0x96   :  { %v771_v35 = vpop.permute.xlu0 %770 }
  0x97   :  { %v781_v4 = vpop.permute.xlu1 %780 }
  0x9a   :  { %v776_v50 = vpop.permute.xlu0 %775 }
  0xf6   :  { %v1005_v9 = vpop.f32.mrb[0].mxu0 }
  0xf7   :  { %v1033_v10 = vpop.f32.mrb[0].mxu1  ;;  %v1006_v11 = vpop.f32.mrb[1].mxu0 }
  0xf8   :  { %v1007_v12 = vadd.f32 %v1006_v11, %v1005_v9  ;;  %v1034_v13 = vpop.f32.mrb[1].mxu1  ;;  %v1008_v14 = vpop.f32.mrb[2].mxu0 }
  0xf9   :  { %v1035_v15 = vadd.f32 %v1034_v13, %v1033_v10  ;;  %v1036_v16 = vpop.f32.mrb[2].mxu1  ;;  %v1009_v17 = vpop.f32.mrb[3].mxu0 }
  0xfa   :  { %v1010_v18 = vadd.f32 %v1009_v17, %v1008_v14  ;;  %v1037_v19 = vpop.f32.mrb[3].mxu1 }
  0xfb   :  { %v398_v20 = vmax.f32 %v1007_v12, %v1035_v15  ;;  %v1038_v21 = vadd.f32 %v1037_v19, %v1036_v16 }
  0xfd   :  { %v399_v22 = vmax.f32 %v1010_v18, %v1038_v21 }
  0xfe   :  { %v1011_v23 = vpop.f32.mrb[4].mxu0 }
  0xff   :  { %v1012_v24 = vpop.f32.mrb[5].mxu0 }
 0x100   :  { %v1013_v25 = vadd.f32 %v1012_v24, %v1011_v23  ;;  %v1014_v26 = vpop.f32.mrb[6].mxu0 }
 0x101   :  { %v1039_v27 = vpop.f32.mrb[4].mxu1  ;;  %v1015_v28 = vpop.f32.mrb[7].mxu0 }
 0x102   :  { %v1040_v29 = vpop.f32.mrb[5].mxu1 }
 0x103   :  { %v1041_v30 = vadd.f32 %v1040_v29, %v1039_v27  ;;  %v1042_v31 = vpop.f32.mrb[6].mxu1 }
 0x104   :  { %v1043_v32 = vpop.f32.mrb[7].mxu1 }
 0x105   :  { %v400_v33 = vmax.f32 %v1013_v25, %v1041_v30 }
 0x116   :  { %v1061_v34 = vpop.f32.mrb[8].mxu0 }
 0x117   :  { %v1089_v36 = vpop.f32.mrb[8].mxu1  ;;  %v1062_v37 = vpop.f32.mrb[9].mxu0 }
 0x118   :  { %v1063_v38 = vadd.f32 %v1062_v37, %v1061_v34  ;;  %v1090_v39 = vpop.f32.mrb[9].mxu1  ;;  %v1064_v40 = vpop.f32.mrb[10].mxu0 }
 0x119   :  { %v1091_v41 = vadd.f32 %v1090_v39, %v1089_v36  ;;  %v1092_v42 = vpop.f32.mrb[10].mxu1  ;;  %v1065_v43 = vpop.f32.mrb[11].mxu0 }
 0x11a   :  { %v580_v44 = vmax.f32 %v398_v20, %v1063_v38  ;;  %v1066_v45 = vadd.f32 %v1065_v43, %v1064_v40  ;;  %v1093_v46 = vpop.f32.mrb[11].mxu1 }
 0x11b   :  { %v1094_v47 = vadd.f32 %v1093_v46, %v1092_v42 }
 0x11c   :  { %v581_v48 = vmax.f32 %v399_v22, %v1066_v45  ;;  %v762_v49 = vmax.f32 %v580_v44, %v1091_v41 }
 0x11e   :  { %v783_v51 = vadd.f32 %v771_v35, %v762_v49  ;;  %v1067_v52 = vpop.f32.mrb[12].mxu0  ;;  %v763_v53 = vmax.f32 %v581_v48, %v1094_v47 }
 0x11f   :  { %v1095_v54 = vpop.f32.mrb[12].mxu1  ;;  %v1068_v55 = vpop.f32.mrb[13].mxu0 }
 0x120   :  { %v786_v56 = vmax.f32 %v783_v51, 0.0  ;;  %v784_v57 = vadd.f32 %v776_v50, %v763_v53  ;;  %v1069_v58 = vadd.f32 %v1068_v55, %v1067_v52  ;;  %v1096_v59 = vpop.f32.mrb[13].mxu1  ;;  %v1070_v60 = vpop.f32.mrb[14].mxu0 }
 0x121   :  { %v1097_v61 = vadd.f32 %v1096_v59, %v1095_v54  ;;  %v1098_v62 = vpop.f32.mrb[14].mxu1  ;;  %v1071_v63 = vpop.f32.mrb[15].mxu0 }
 0x122   :  { %v986_v0 = vpack.c.bf16 %v786_v56, %v786_v56  ;;  %v787_v1 = vmax.f32 %v784_v57, 0.0  ;;  %v582_v2 = vmax.f32 %v400_v33, %v1069_v58  ;;  %v1099_v3 = vpop.f32.mrb[15].mxu1 }
 0x124   :  { %803 = vst.msk [vmem:[%s1444_s3] sm:$0xf] %vm802_vm2, %v986_v0  ;;  %v987_v5 = vpack.c.bf16 %v787_v1, %v787_v1  ;;  %v764_v6 = vmax.f32 %v582_v2, %v1097_v61 }
 0x126   :  { %804 = vst.msk [vmem:[%s1444_s3 + $0x4] sm:$0xf] %vm802_vm2, %v987_v5  ;;  %v785_v7 = vadd.f32 %v781_v4, %v764_v6 }
 0x128   :  { %v788_v8 = vmax.f32 %v785_v7, 0.0 }
 0x12a   :  { %v988_v9 = vpack.c.bf16 %v788_v8, %v788_v8 }
 0x12c   :  { %806 = vst.msk [vmem:[%s1444_s3 + $0x8] sm:$0x3] %vm805_vm3, %v988_v9 }

// kernel: net_forward.5
= control target key start
LH: loop header
LB: loop body
LE: loop exit
PB: predicated region body
PF: predicated region fallthrough
CT: control target
= control target key end

     0   :  { %v877_v1 = vmov 0   ;;  %vm412_vm0 = vcmask 1041408   ;;  %vm399_vm1 = vcmask 949248   ;;  %v878_v60 = vmov 0.0   ;;  %s1099_s0 = inlined_call_operand.vmem [shape: bf16[500,2], index: 0, kind: input, shape index: {}]   ;;  %s1100_s1 = inlined_call_operand.vmem [shape: bf16[50,500], index: 1, kind: input, shape index: {}]   ;;  %s1101_s2 = inlined_call_operand.vmem [shape: f32[50,1], index: 2, kind: input, shape index: {}]   ;;  %s1102_s4 = inlined_call_operand.vmem [shape: f32[10,1], index: 4, kind: input, shape index: {}]   ;;  %s1103_s3 = inlined_call_operand.vmem [shape: bf16[10,50], index: 3, kind: input, shape index: {}]   ;;  %s1104_s5 = inlined_call_operand.vmem [shape: f32[10,2], index: 5, kind: output, shape index: {}]  }
   0x1   :  { %v816_v0 = vld [vmem:[%s1099_s0 + $0x40] sm:$0xff]   ;;  %814 = vset.pattern.permute.xlu0 %v877_v1  ;;  %815 = vset.pattern.permute.xlu1 %v877_v1  ;;  %v820_v5 = vld [vmem:[%s1099_s0 + $0x48] sm:$0xff]   ;;  %v824_v9 = vld [vmem:[%s1099_s0 + $0x50] sm:$0xff]   ;;  %vm879_vm2 = vmmov 0   ;;  %vm578_vm3 = vcmask 1040384   ;;  %vm574_vm4 = vcmask 408576  }
   0x2   :  { %v817_v2 = vld [vmem:[%s1099_s0 + $0xc0] sm:$0xff]   ;;  %713 = vmatprep.subr.bf16.mxu0 %v816_v0  ;;  %v821_v6 = vld [vmem:[%s1099_s0 + $0xc8] sm:$0xff]   ;;  %v825_v10 = vld [vmem:[%s1099_s0 + $0xd0] sm:$0xff]   ;;  %vm623_vm5 = vcmask 15360   ;;  %vm625_vm6 = vcmask 9216  }
   0x3   :  { %v818_v3 = vld [vmem:[%s1099_s0] sm:$0xff]   ;;  %753 = vmatprep.subr.bf16.mxu1 %v817_v2  ;;  %v822_v7 = vld [vmem:[%s1099_s0 + $0x8] sm:$0xff]   ;;  %v826_v11 = vld [vmem:[%s1099_s0 + $0x10] sm:$0xff]  }
   0x4   :  { %v819_v4 = vld [vmem:[%s1099_s0 + $0x80] sm:$0xff]   ;;  %714 = vmatpush3.bf16.msra.mxu0 %v818_v3  ;;  %v823_v8 = vld [vmem:[%s1099_s0 + $0x88] sm:$0xff]   ;;  %v827_v12 = vld [vmem:[%s1099_s0 + $0x90] sm:$0xff]  }
   0x5   :  { %754 = vmatpush3.bf16.msra.mxu1 %v819_v4  ;;  %715 = vmatprep.subr.bf16.mxu0 %v820_v5  ;;  %v828_v13 = vld [vmem:[%s1099_s0 + $0x58] sm:$0xff]   ;;  %v832_v17 = vld [vmem:[%s1099_s0 + $0x60] sm:$0xff]   ;;  %v836_v21 = vld [vmem:[%s1099_s0 + $0x68] sm:$0xff]  }
   0x6   :  { %755 = vmatprep.subr.bf16.mxu1 %v821_v6  ;;  %v829_v14 = vld [vmem:[%s1099_s0 + $0xd8] sm:$0xff]   ;;  %v833_v18 = vld [vmem:[%s1099_s0 + $0xe0] sm:$0xff]   ;;  %v837_v22 = vld [vmem:[%s1099_s0 + $0xe8] sm:$0xff]  }
   0x7   :  { %v830_v15 = vld [vmem:[%s1099_s0 + $0x18] sm:$0xff]   ;;  %v834_v19 = vld [vmem:[%s1099_s0 + $0x20] sm:$0xff]   ;;  %v838_v23 = vld [vmem:[%s1099_s0 + $0x28] sm:$0xff]  }
   0x8   :  { %716 = vmatpush3.bf16.msra.mxu0 %v822_v7  ;;  %v831_v16 = vld [vmem:[%s1099_s0 + $0x98] sm:$0xff]   ;;  %v835_v20 = vld [vmem:[%s1099_s0 + $0xa0] sm:$0xff]   ;;  %v839_v24 = vld [vmem:[%s1099_s0 + $0xa8] sm:$0xff]  }
   0x9   :  { %756 = vmatpush3.bf16.msra.mxu1 %v823_v8  ;;  %717 = vmatprep.subr.bf16.mxu0 %v824_v9  ;;  %v840_v25 = vld [vmem:[%s1099_s0 + $0x70] sm:$0xff]   ;;  %v844_v29 = vld [vmem:[%s1099_s0 + $0x78] sm:$0xff]   ;;  %v98_v41 = vld [vmem:[%s1101_s2] sm:$0xff] }
   0xa   :  { %757 = vmatprep.subr.bf16.mxu1 %v825_v10  ;;  %v841_v26 = vld [vmem:[%s1099_s0 + $0xf0] sm:$0xff]   ;;  %v845_v30 = vld [vmem:[%s1099_s0 + $0xf8] ss:$0 sps:$4 sm:$0x33]   ;;  %v853_v36 = vld [vmem:[%s1100_s1 + $0xc] ss:$16 sps:$4 sm:$0xff]   ;;  %107 = vperm.xlu0 %814, %v98_v41  }
   0xb   :  { %v842_v27 = vld [vmem:[%s1099_s0 + $0x30] sm:$0xff]   ;;  %v846_v31 = vld [vmem:[%s1099_s0 + $0x38] sm:$0xff]   ;;  %707 = vmatprep.mubr.msk.bf16.mxu1 %vm399_vm1, %v853_v36  ;;  %v99_v45 = vld [vmem:[%s1101_s2 + $0x8] sm:$0xff] }
   0xc   :  { %718 = vmatpush3.bf16.msra.mxu0 %v826_v11  ;;  %v843_v28 = vld [vmem:[%s1099_s0 + $0xb0] sm:$0xff]   ;;  %v847_v32 = vld [vmem:[%s1099_s0 + $0xb8] sm:$0xff]   ;;  %v33_v47 = vld [vmem:[%s1100_s1 + $0x60] sm:$0x11] }
   0xd   :  { %758 = vmatpush3.bf16.msra.mxu1 %v827_v12  ;;  %719 = vmatprep.subr.bf16.mxu0 %v828_v13  ;;  %v848_v33 = vld [vmem:[%s1100_s1] ss:$16 sps:$4 sm:$0xff]   ;;  %v850_v34 = vld [vmem:[%s1100_s1 + $0x4] ss:$16 sps:$4 sm:$0xff]   ;;  %v851_v35 = vld [vmem:[%s1100_s1 + $0x8] ss:$16 sps:$4 sm:$0xff]   ;;  %v672_v52 = vcombine.high %v33_v47, %v33_v47  ;;  %v671_v58 = vcombine.low %v33_v47, %v33_v47 }
   0xe   :  { %759 = vmatprep.subr.bf16.mxu1 %v829_v14  ;;  %448 = vmatprep.mubr.bf16.mxu0 %v850_v34  ;;  %v854_v37 = vld [vmem:[%s1100_s1 + $0x24] ss:$16 sps:$4 sm:$0xff]   ;;  %v856_v38 = vld [vmem:[%s1100_s1 + $0x2c] ss:$16 sps:$4 sm:$0xff]   ;;  %v858_v39 = vld [vmem:[%s1100_s1 + $0x20] ss:$16 sps:$4 sm:$0xff]  }
   0xf   :  { %v860_v40 = vld [vmem:[%s1100_s1 + $0x44] ss:$16 sps:$4 sm:$0xff]   ;;  %v859_v42 = vld [vmem:[%s1100_s1 + $0x28] ss:$16 sps:$4 sm:$0xff]   ;;  %v862_v44 = vld [vmem:[%s1100_s1 + $0x4c] ss:$16 sps:$4 sm:$0xff]   ;;  %112 = vperm.xlu0 %814, %v99_v45  }
  0x10   :  { %720 = vmatpush3.bf16.msra.mxu0 %v830_v15  ;;  %v100_v43 = vld [vmem:[%s1101_s2 + $0x10] sm:$0xff]  ;;  %v101_v46 = vld [vmem:[%s1101_s2 + $0x18] sm:$0xff]  ;;  %v102_v48 = vld [vmem:[%s1101_s2 + $0x20] sm:$0xff] }
  0x11   :  { %760 = vmatpush3.bf16.msra.mxu1 %v831_v16  ;;  %721 = vmatprep.subr.bf16.mxu0 %v832_v17  ;;  %v864_v49 = vld [vmem:[%s1100_s1 + $0x40] ss:$16 sps:$4 sm:$0xff]   ;;  %v34_v50 = vld [vmem:[%s1100_s1 + $0x68] sm:$0x11] }
  0x12   :  { %761 = vmatprep.subr.bf16.mxu1 %v833_v18  ;;  %117 = vperm.xlu1 %815, %v100_v43   ;;  %v103_v51 = vld [vmem:[%s1101_s2 + $0x28] sm:$0xff]  ;;  %v674_v54 = vcombine.high %v34_v50, %v34_v50  ;;  %v104_v55 = vld [vmem:[%s1101_s2 + $0x30] sm:$0x3]  ;;  %v557_v56 = vld [vmem:[%s1102_s4] sm:$0xff]  ;;  %v673_v59 = vcombine.low %v34_v50, %v34_v50 }
  0x13   :  { %v865_v53 = vld [vmem:[%s1100_s1 + $0x48] ss:$16 sps:$4 sm:$0xff]   ;;  %127 = vperm.xlu0 %814, %v102_v48  }
  0x14   :  { %722 = vmatpush3.bf16.msra.mxu0 %v834_v19  ;;  %v558_v57 = vld [vmem:[%s1102_s4 + $0x8] sm:$0x3] }
  0x15   :  { %762 = vmatpush3.bf16.msra.mxu1 %v835_v20  ;;  %723 = vmatprep.subr.bf16.mxu0 %v836_v21 }
  0x16   :  { %763 = vmatprep.subr.bf16.mxu1 %v837_v22  ;;  %122 = vperm.xlu1 %815, %v101_v46  }
  0x17   :  { %137 = vperm.xlu0 %814, %v104_v55  }
  0x18   :  { %724 = vmatpush3.bf16.msra.mxu0 %v838_v23 }
  0x19   :  { %764 = vmatpush3.bf16.msra.mxu1 %v839_v24  ;;  %725 = vmatprep.subr.bf16.mxu0 %v840_v25 }
  0x1a   :  { %765 = vmatprep.subr.bf16.mxu1 %v841_v26  ;;  %132 = vperm.xlu1 %815, %v103_v51  }
  0x1b   :  { %566 = vperm.xlu0 %814, %v558_v57  }
  0x1c   :  { %726 = vmatpush3.bf16.msra.mxu0 %v842_v27 }
  0x1d   :  { %766 = vmatpush3.bf16.msra.mxu1 %v843_v28  ;;  %727 = vmatprep.subr.bf16.mxu0 %v844_v29 }
  0x1e   :  { %810 = vmatprep.subr.msk.bf16.mxu1 %vm412_vm0, %v845_v30  ;;  %561 = vperm.xlu1 %815, %v557_v56  }
  0x20   :  { %728 = vmatpush3.bf16.msra.mxu0 %v846_v31 }
  0x21   :  { %768 = vmatpush3.bf16.msra.mxu1 %v847_v32  ;;  %798 = vmatprep.subr.bf16.mxu0 %v878_v60 }
  0x23   :  { %449 = vmatmul.mubr.bf16.vlgmr.msra.gmra.mrb[0].mxu0 %v848_v33 }
  0x24   :  { %513 = vmatmul.mubr.bf16.vlgmr.msra.gmra.mrb[0].mxu1 %v851_v35  ;;  %456 = vmatprep.mubr.bf16.mxu0 %v854_v37 }
  0x25   :  { %708 = vmatprep.mubr.msk.bf16.mxu1 %vm399_vm1, %v856_v38 }
  0x2b   :  { %457 = vmatmul.mubr.bf16.gmra.mrb[4].mxu0 %v858_v39 }
  0x2c   :  { %464 = vmatprep.mubr.bf16.mxu0 %v860_v40  ;;  %521 = vmatmul.mubr.bf16.gmra.mrb[4].mxu1 %v859_v42 }
  0x2d   :  { %709 = vmatprep.mubr.msk.bf16.mxu1 %vm399_vm1, %v862_v44 }
  0x33   :  { %465 = vmatmul.mubr.bf16.gmra.mrb[8].mxu0 %v864_v49 }
  0x34   :  { %472 = vmatprep.mubr.bf16.mxu0 %v672_v52  ;;  %529 = vmatmul.mubr.bf16.gmra.mrb[8].mxu1 %v865_v53 }
  0x35   :  { %710 = vmatprep.mubr.msk.bf16.mxu1 %vm399_vm1, %v674_v54 }
  0x3b   :  { %473 = vmatmul.mubr.bf16.gmra.mrb[12].mxu0 %v671_v58 }
  0x3c   :  { %537 = vmatmul.mubr.bf16.gmra.mrb[12].mxu1 %v673_v59  ;;  %806 = vmatprep.mubr.msk.bf16.mxu0 %vm879_vm2, %v878_v60 }
  0x89   :  { %v108_v61 = vpop.permute.xlu0 %107 }
  0x8e   :  { %v113_v9 = vpop.permute.xlu0 %112 }
  0x91   :  { %v118_v14 = vpop.permute.xlu1 %117 }
  0x92   :  { %v128_v37 = vpop.permute.xlu0 %127 }
  0x95   :  { %v123_v30 = vpop.permute.xlu1 %122 }
  0x96   :  { %v138_v58 = vpop.permute.xlu0 %137 }
  0x99   :  { %v133_v51 = vpop.permute.xlu1 %132 }
  0xf6   :  { %v729_v62 = vpop.f32.mrb[0].mxu0 }
  0xf7   :  { %v730_v63 = vpop.f32.mrb[1].mxu0  ;;  %v769_v0 = vpop.f32.mrb[0].mxu1 }
  0xf8   :  { %v731_v1 = vadd.f32 %v730_v63, %v729_v62  ;;  %v732_v2 = vpop.f32.mrb[2].mxu0  ;;  %v770_v3 = vpop.f32.mrb[1].mxu1 }
  0xf9   :  { %v733_v4 = vpop.f32.mrb[3].mxu0  ;;  %v771_v6 = vadd.f32 %v770_v3, %v769_v0  ;;  %v772_v7 = vpop.f32.mrb[2].mxu1 }
  0xfa   :  { %v451_v5 = vadd.f32 %v731_v1, %v108_v61  ;;  %v734_v8 = vadd.f32 %v733_v4, %v732_v2  ;;  %v773_v10 = vpop.f32.mrb[3].mxu1 }
  0xfb   :  { %v774_v13 = vadd.f32 %v773_v10, %v772_v7 }
  0xfc   :  { %v515_v11 = vadd.f32 %v771_v6, %v451_v5  ;;  %v454_v12 = vadd.f32 %v734_v8, %v113_v9 }
  0xfe   :  { %v518_v15 = vadd.f32 %v774_v13, %v454_v12  ;;  %v735_v16 = vpop.f32.mrb[4].mxu0  ;;  %v544_v18 = vmax.f32 %v515_v11, 0.0  ;;  %v870_v13 = vld [vmem:[%s1103_s3] sm:$0x1f]  }
  0xff   :  { %v736_v17 = vpop.f32.mrb[5].mxu0  ;;  %v775_v20 = vpop.f32.mrb[4].mxu1 }
 0x100   :  { %v545_v19 = vmax.f32 %v518_v15, 0.0  ;;  %v737_v21 = vadd.f32 %v736_v17, %v735_v16  ;;  %v738_v22 = vpop.f32.mrb[6].mxu0  ;;  %v776_v23 = vpop.f32.mrb[5].mxu1 }
 0x101   :  { %v739_v24 = vpop.f32.mrb[7].mxu0  ;;  %v777_v27 = vadd.f32 %v776_v23, %v775_v20  ;;  %v778_v28 = vpop.f32.mrb[6].mxu1 }
 0x102   :  { %v553_v25 = vpack.c.bf16 %v545_v19, %v544_v18  ;;  %v459_v26 = vadd.f32 %v737_v21, %v118_v14  ;;  %v740_v29 = vadd.f32 %v739_v24, %v738_v22  ;;  %v779_v31 = vpop.f32.mrb[7].mxu1  ;;  %v562_v14 = vpop.permute.xlu1 %561 }
 0x103   :  { %v780_v34 = vadd.f32 %v779_v31, %v778_v28  ;;  %v567_v18 = vpop.permute.xlu0 %566 }
 0x104   :  { %v523_v32 = vadd.f32 %v777_v27, %v459_v26  ;;  %v462_v33 = vadd.f32 %v740_v29, %v123_v30  ;;  %799 = vmatpush3.bf16.msra.mxu0 %v553_v25 }
 0x105   :  { %800 = vmatprep.subr.bf16.mxu0 %v878_v60 }
 0x106   :  { %v526_v35 = vadd.f32 %v780_v34, %v462_v33  ;;  %v741_v36 = vpop.f32.mrb[8].mxu0  ;;  %v546_v39 = vmax.f32 %v523_v32, 0.0 }
 0x107   :  { %v742_v38 = vpop.f32.mrb[9].mxu0  ;;  %v781_v41 = vpop.f32.mrb[8].mxu1 }
 0x108   :  { %v547_v40 = vmax.f32 %v526_v35, 0.0  ;;  %v743_v42 = vadd.f32 %v742_v38, %v741_v36  ;;  %v744_v43 = vpop.f32.mrb[10].mxu0  ;;  %v782_v44 = vpop.f32.mrb[9].mxu1 }
 0x109   :  { %v745_v45 = vpop.f32.mrb[11].mxu0  ;;  %v783_v48 = vadd.f32 %v782_v44, %v781_v41  ;;  %v784_v49 = vpop.f32.mrb[10].mxu1 }
 0x10a   :  { %v554_v46 = vpack.c.bf16 %v547_v40, %v546_v39  ;;  %v467_v47 = vadd.f32 %v743_v42, %v128_v37  ;;  %v746_v50 = vadd.f32 %v745_v45, %v744_v43  ;;  %v785_v52 = vpop.f32.mrb[11].mxu1 }
 0x10b   :  { %v786_v55 = vadd.f32 %v785_v52, %v784_v49 }
 0x10c   :  { %v531_v53 = vadd.f32 %v783_v48, %v467_v47  ;;  %v470_v54 = vadd.f32 %v746_v50, %v133_v51  ;;  %801 = vmatpush3.bf16.msra.mxu0 %v554_v46 }
 0x10d   :  { %802 = vmatprep.subr.bf16.mxu0 %v878_v60 }
 0x10e   :  { %v534_v56 = vadd.f32 %v786_v55, %v470_v54  ;;  %v747_v57 = vpop.f32.mrb[12].mxu0  ;;  %v548_v61 = vmax.f32 %v531_v53, 0.0 }
 0x10f   :  { %v748_v59 = vpop.f32.mrb[13].mxu0  ;;  %v787_v63 = vpop.f32.mrb[12].mxu1 }
 0x110   :  { %v549_v62 = vmax.f32 %v534_v56, 0.0  ;;  %v749_v0 = vadd.f32 %v748_v59, %v747_v57  ;;  %v750_v1 = vpop.f32.mrb[14].mxu0  ;;  %v788_v2 = vpop.f32.mrb[13].mxu1 }
 0x111   :  { %v751_v3 = vpop.f32.mrb[15].mxu0  ;;  %v789_v6 = vadd.f32 %v788_v2, %v787_v63  ;;  %v790_v7 = vpop.f32.mrb[14].mxu1 }
 0x112   :  { %v555_v4 = vpack.c.bf16 %v549_v62, %v548_v61  ;;  %v475_v5 = vadd.f32 %v749_v0, %v138_v58  ;;  %v791_v8 = vpop.f32.mrb[15].mxu1 }
 0x114   :  { %v539_v9 = vadd.f32 %v789_v6, %v475_v5  ;;  %803 = vmatpush3.bf16.msra.mxu0 %v555_v4 }
 0x115   :  { %804 = vmatprep.subr.bf16.mxu0 %v878_v60 }
 0x116   :  { %v550_v10 = vmax.f32 %v539_v9, 0.0 }
 0x118   :  { %v556_v11 = vpack.c.bf16 %v550_v10, %v550_v10 }
 0x11a   :  { %v580_v12 = vsel %vm578_vm3, %v556_v11, 0 }
 0x11b   :  { %805 = vmatpush3.bf16.msra.mxu0 %v580_v12 }
 0x11e   :  { %807 = vmatmul.mubr.msk.bf16.vlgmr.msra.gmra.mrb[16].mxu0 %vm574_vm4, %v870_v13 }
 0x1f1   :  { %v616_v15 = vpop.f32.mrb[16].mxu0 }
 0x1f2   :  { %v617_v16 = vadd.f32 %v616_v15, %v562_v14  ;;  %v808_v17 = vpop.f32.mrb[17].mxu0 }
 0x1f3   :  { %v619_v19 = vpop.f32.mrb[18].mxu0 }
 0x1f4   :  { %v620_v60 = vadd.f32 %v619_v19, %v567_v18  ;;  %v809_v20 = vpop.f32.mrb[19].mxu0  ;;  %v624_v21 = vsel %vm623_vm5, %v617_v16, -inf }
 0x1f6   :  { %v626_v22 = vsel %vm625_vm6, %v620_v60, -inf }
 0x1f7   :  { %v627_v23 = vmax.f32 %v624_v21, %v626_v22 }
 0x1f9   :  { %v628_v24 = vrot.slane %v627_v23, 4 }
 0x1fb   :  { %v629_v25 = vmax.f32 %v627_v23, %v628_v24 }
 0x1fd   :  { %v630_v26 = vrot.slane %v629_v25, 2 }
 0x1ff   :  { %v631_v27 = vmax.f32 %v629_v25, %v630_v26 }
 0x201   :  { %v632_v28 = vrot.slane %v631_v27, 1 }
 0x203   :  { %v633_v29 = vmax.f32 %v631_v27, %v632_v28 }
 0x205   :  { %v634_v30 = vsub.f32 %v617_v16, %v633_v29  ;;  %v635_v31 = vsub.f32 %v620_v60, %v633_v29 }
 0x207   :  { %v636_v32 = vmul.f32 1.442695, %v634_v30  ;;  %v638_v33 = vmul.f32 1.442695, %v635_v31 }
 0x209   :  { %871 = vpow2.f32 %v636_v32 }
 0x20a   :  { %873 = vpow2.f32 %v638_v33 }
 0x213   :  { %v872_v34 = vpop.eup %871 }
 0x214   :  { %v874_v35 = vpop.eup %873  ;;  %v640_v36 = vsel %vm623_vm5, %v872_v34, 0.0 }
 0x215   :  { %v641_v37 = vsel %vm625_vm6, %v874_v35, 0.0 }
 0x216   :  { %v642_v38 = vadd.f32 %v641_v37, %v640_v36 }
 0x218   :  { %v643_v39 = vrot.slane %v642_v38, 4 }
 0x21a   :  { %v644_v40 = vadd.f32 %v643_v39, %v642_v38 }
 0x21c   :  { %v645_v41 = vrot.slane %v644_v40, 2 }
 0x21e   :  { %v646_v42 = vadd.f32 %v645_v41, %v644_v40 }
 0x220   :  { %v647_v43 = vrot.slane %v646_v42, 1 }
 0x222   :  { %v648_v44 = vadd.f32 %v647_v43, %v646_v42 }
 0x224   :  { %875 = vlog2.f32 %v648_v44 }
 0x22e   :  { %v876_v45 = vpop.eup %875 }
 0x22f   :  { %v650_v46 = vmul.f32 0.6931472, %v876_v45 }
 0x231   :  { %v651_v47 = vsub.f32 %v634_v30, %v650_v46  ;;  %v652_v48 = vsub.f32 %v635_v31, %v650_v46 }
 0x233   :  { %653 = vst.msk [vmem:[%s1104_s5] sm:$0xff] %vm623_vm5, %v651_v47 }
 0x234   :  { %654 = vst.msk [vmem:[%s1104_s5 + $0x8] sm:$0x3] %vm625_vm6, %v652_v48 }

</bundles_post_ra>
